<compile_context>
chip_gen: v7x
topology: tpu7x:2x2x1
jax: 0.10.0
libtpu: 0.0.40
codegen_flags: <defaults>
</compile_context>

<pallas_src>
import functools

import jax
import jax.numpy as jnp
from jax import lax
from jax.experimental import pallas as pl
from jax.experimental.pallas import tpu as pltpu


# ----------------------------------------------------------------------------
# Parameter folding helpers (plain JAX)
# ----------------------------------------------------------------------------

def _bn_fold(gamma, beta, mean, var, eps=1e-5):
    scale = gamma / jnp.sqrt(var + eps)
    return scale, beta - mean * scale


def _ib_gate_and_kld(mu, logD, eps=1e-8, threshold=0.0):
    logalpha = logD - jnp.log(mu * mu + eps)
    gate = mu * (logalpha < threshold).astype(mu.dtype)
    kld = 0.5 * jnp.sum(jnp.log1p(mu * mu / (jnp.exp(logD) + eps)))
    return gate, kld


# ----------------------------------------------------------------------------
# Fused Pallas kernel: conv1 -> dw3x3 -> conv3 (+residual) for one row tile
# ----------------------------------------------------------------------------

def _fused_block_kernel(x_ref, w1_ref, b1_ref, w2_ref, b2_ref, w3_ref, b3_ref,
                        o_ref, mid_ref, *,
                        stride, TH, TH_in, W, Wo, Cin, Cmid, Cout,
                        RT, skip, zero_bottom):
    j = pl.program_id(1)
    row0 = j * (TH * stride)        # first padded-intermediate row of this tile

    # ---- conv1 (1x1, bf16 MXU) + folded BN1 + ReLU6 --------------------------
    xw = x_ref[0, pl.ds(row0, TH_in)]                       # (TH_in, W, Cin) bf16
    y1 = jnp.dot(xw.reshape(TH_in * W, Cin), w1_ref[...],
                 preferred_element_type=jnp.float32)
    y1 = y1.reshape(TH_in, W, Cmid) + b1_ref[...].reshape(1, 1, Cmid)
    y1 = jnp.clip(y1, 0.0, 6.0)

    # Rows that correspond to the 3x3 conv's zero-padding in H must be zero.
    rows = lax.broadcasted_iota(jnp.int32, (TH_in, 1, 1), 0)
    pad_row = (j == 0) & (rows == 0)
    if zero_bottom:
        pad_row = pad_row | ((j == RT - 1) & (rows == TH_in - 1))
    y1 = jnp.where(pad_row, 0.0, y1)

    # Stage the padded intermediate in VMEM scratch (zero-pad in W here).
    mid_ref[:, 1:W + 1, :] = y1
    zcol = jnp.zeros((TH_in, 1, Cmid), jnp.float32)
    mid_ref[:, 0:1, :] = zcol
    mid_ref[:, W + 1:W + 2, :] = zcol

    # ---- depthwise 3x3 (VPU, f32) + folded BN2 + ReLU6 -----------------------
    mid = mid_ref[...]                                      # (TH_in, W+2, Cmid)
    w2 = w2_ref[...]                                        # (9, Cmid)
    acc = jnp.zeros((TH, Wo, Cmid), jnp.float32)
    if stride == 1:
        for kh in range(3):
            for kw in range(3):
                win = mid[kh:kh + TH, kw:kw + Wo, :]
                acc = acc + win * w2[kh * 3 + kw].reshape(1, 1, Cmid)
    else:
        # De-interleave the costly sublane (W) axis once; every tap then uses a
        # unit-stride W window (H selection is a cheap slab stride).
        even = mid[:, 0::2, :]
        odd = mid[:, 1::2, :]
        hlim = stride * (TH - 1) + 1
        for kh in range(3):
            for kw in range(3):
                src = even if kw % 2 == 0 else odd
                ws = kw // 2
                win = src[kh:kh + hlim:stride, ws:ws + Wo, :]
                acc = acc + win * w2[kh * 3 + kw].reshape(1, 1, Cmid)
    y2 = jnp.clip(acc + b2_ref[...].reshape(1, 1, Cmid), 0.0, 6.0)

    # ---- conv3 (1x1, bf16 MXU) + folded BN3/IB3 (+ residual) -----------------
    y3 = jnp.dot(y2.astype(jnp.bfloat16).reshape(TH * Wo, Cmid), w3_ref[...],
                 preferred_element_type=jnp.float32)
    y3 = y3.reshape(TH, Wo, Cout) + b3_ref[...].reshape(1, 1, Cout)
    if skip:
        res = x_ref[0, pl.ds(j * TH + 1, TH)]               # (TH, W==Wo, Cin==Cout)
        y3 = y3 + res.astype(jnp.float32)
    o_ref[...] = y3.reshape(1, TH, Wo, Cout)


# ----------------------------------------------------------------------------
# Wrapper
# ----------------------------------------------------------------------------

def linear_bottleneck_ib_forward(params, x_nchw, *, stride, row_tile=8):
    N, Cin, H, W = x_nchw.shape
    Cmid = params["w1"].shape[1]
    Cout = params["w3"].shape[1]

    Ho = (H - 1) // stride + 1
    Wo = (W - 1) // stride + 1
    Wp = W + 2

    # Output-row tile (largest divisor of Ho not exceeding row_tile).
    TH = max(d for d in range(1, min(row_tile, Ho) + 1) if Ho % d == 0)
    RT = Ho // TH
    TH_in = (TH - 1) * stride + 3
    zero_bottom = ((Ho - 1) * stride + 2 == H + 1)   # bottom pad row ever used?
    skip = (stride == 1 and Cin == Cout)

    # ---- fold eval-mode BN and IB gates into the conv weights ----------------
    s1, b1 = _bn_fold(*params["bn1"])
    s2, b2 = _bn_fold(*params["bn2"])
    s3, b3 = _bn_fold(*params["bn3"])
    g1, k1 = _ib_gate_and_kld(*params["ib1"])
    g2, k2 = _ib_gate_and_kld(*params["ib2"])
    g3, k3 = _ib_gate_and_kld(*params["ib3"])

    w1_eff = (params["w1"] * s1[None, :]).astype(jnp.bfloat16)            # (Cin, Cmid)
    w2_eff = params["w2"] * (s2 * g1)[None, :]                            # (9, Cmid) f32
    w3_eff = ((g2[:, None] * params["w3"]) * (s3 * g3)[None, :]).astype(jnp.bfloat16)
    b1 = b1.reshape(1, Cmid)
    b2 = b2.reshape(1, Cmid)
    b3_eff = (b3 * g3).reshape(1, Cout)

    # NCHW -> NHWC, pad H by 1 (cheap: narrow tensor), bf16 for MXU + less DMA.
    x = jnp.transpose(x_nchw, (0, 2, 3, 1))
    x_h = jnp.pad(x, ((0, 0), (1, 1), (0, 0), (0, 0))).astype(jnp.bfloat16)

    kernel = functools.partial(
        _fused_block_kernel, stride=stride, TH=TH, TH_in=TH_in, W=W, Wo=Wo,
        Cin=Cin, Cmid=Cmid, Cout=Cout, RT=RT, skip=skip, zero_bottom=zero_bottom)

    flops = 2 * N * H * W * Cin * Cmid + 2 * N * Ho * Wo * Cmid * (9 + Cout)
    bytes_accessed = (x_h.size * 2 + N * Ho * Wo * Cout * 4
                      + w1_eff.size * 2 + w3_eff.size * 2
                      + (w2_eff.size + b1.size + b2.size + b3_eff.size) * 4)

    out_nhwc = pl.pallas_call(
        kernel,
        out_shape=jax.ShapeDtypeStruct((N, Ho, Wo, Cout), jnp.float32),
        grid=(N, RT),
        in_specs=[
            pl.BlockSpec((1, H + 2, W, Cin), lambda n, j: (n, 0, 0, 0)),
            pl.BlockSpec((Cin, Cmid), lambda n, j: (0, 0)),
            pl.BlockSpec((1, Cmid), lambda n, j: (0, 0)),
            pl.BlockSpec((9, Cmid), lambda n, j: (0, 0)),
            pl.BlockSpec((1, Cmid), lambda n, j: (0, 0)),
            pl.BlockSpec((Cmid, Cout), lambda n, j: (0, 0)),
            pl.BlockSpec((1, Cout), lambda n, j: (0, 0)),
        ],
        out_specs=pl.BlockSpec((1, TH, Wo, Cout), lambda n, j: (n, j, 0, 0)),
        scratch_shapes=[pltpu.VMEM((TH_in, Wp, Cmid), jnp.float32)],
        compiler_params=pltpu.CompilerParams(
            dimension_semantics=("parallel", "parallel"),
            vmem_limit_bytes=32 * 1024 * 1024),
        cost_estimate=pl.CostEstimate(
            flops=flops, transcendentals=0, bytes_accessed=bytes_accessed),
    )(x_h, w1_eff, b1, w2_eff, b2, w3_eff, b3_eff)

    out = jnp.transpose(out_nhwc, (0, 3, 1, 2))   # back to NCHW at the boundary
    return out, k1 + k2 + k3


# ----------------------------------------------------------------------------
# Deterministic parameter construction + pure-JAX reference
# ----------------------------------------------------------------------------

def init_params(key, inplanes, outplanes, t):
    Cmid = inplanes * t
    ks = jax.random.split(key, 9)

    def bn(k, C):
        a = jax.random.split(k, 4)
        gamma = 1.0 + 0.1 * jax.random.normal(a[0], (C,), jnp.float32)
        beta = 0.1 * jax.random.normal(a[1], (C,), jnp.float32)
        mean = 0.1 * jax.random.normal(a[2], (C,), jnp.float32)
        var = 0.9 + 0.1 * jnp.abs(jax.random.normal(a[3], (C,), jnp.float32))
        return gamma, beta, mean, var

    def ib(k, C):
        a = jax.random.split(k, 2)
        mu = 1.0 + 0.1 * jax.random.normal(a[0], (C,), jnp.float32)
        logD = -9.0 + 0.1 * jax.random.normal(a[1], (C,), jnp.float32)
        return mu, logD

    return {
        # conv1: torch (Cmid, Cin, 1, 1) stored as matmul weight (Cin, Cmid)
        "w1": 0.1 * jax.random.normal(ks[0], (inplanes, Cmid), jnp.float32),
        # conv2: torch (Cmid, 1, 3, 3) stored as (kh*3+kw, Cmid)
        "w2": 0.1 * jax.random.normal(ks[1], (9, Cmid), jnp.float32),
        # conv3: torch (Cout, Cmid, 1, 1) stored as (Cmid, Cout)
        "w3": 0.1 * jax.random.normal(ks[2], (Cmid, outplanes), jnp.float32),
        "bn1": bn(ks[3], Cmid), "bn2": bn(ks[4], Cmid), "bn3": bn(ks[5], outplanes),
        "ib1": ib(ks[6], Cmid), "ib2": ib(ks[7], Cmid), "ib3": ib(ks[8], outplanes),
    }


def reference_forward(params, x_nchw, *, stride):
    hp = jax.lax.Precision.HIGHEST
    x = jnp.transpose(x_nchw, (0, 2, 3, 1))
    Cmid = params["w1"].shape[1]
    Cout = params["w3"].shape[1]
    s1, b1 = _bn_fold(*params["bn1"]); s2, b2 = _bn_fold(*params["bn2"])
    s3, b3 = _bn_fold(*params["bn3"])
    g1, k1 = _ib_gate_and_kld(*params["ib1"])
    g2, k2 = _ib_gate_and_kld(*params["ib2"])
    g3, k3 = _ib_gate_and_kld(*params["ib3"])

    y = jnp.einsum("nhwc,cd->nhwd", x, params["w1"], precision=hp)
    y = jnp.clip(y * s1 + b1, 0.0, 6.0) * g1

    wdw = params["w2"].reshape(3, 3, 1, Cmid)
    y = jax.lax.conv_general_dilated(
        y, wdw, window_strides=(stride, stride), padding=((1, 1), (1, 1)),
        dimension_numbers=("NHWC", "HWIO", "NHWC"),
        feature_group_count=Cmid, precision=hp)
    y = jnp.clip(y * s2 + b2, 0.0, 6.0) * g2

    y = jnp.einsum("nhwc,cd->nhwd", y, params["w3"], precision=hp)
    y = (y * s3 + b3) * g3
    if stride == 1 and x.shape[-1] == Cout:
        y = y + x
    return jnp.transpose(y, (0, 3, 1, 2)), k1 + k2 + k3


# ----------------------------------------------------------------------------

if __name__ == "__main__":
    key = jax.random.PRNGKey(0)
    kx, kp = jax.random.split(key)

    N, inplanes, H, W = 2, 4, 16, 16
    outplanes, t = 4, 6
    x = jax.random.normal(kx, (N, inplanes, H, W), jnp.float32)
    params = init_params(kp, inplanes, outplanes, t)

    for stride in (1, 2):   # stride=1 exercises the residual path, 2 the strided dw
        out, kld = linear_bottleneck_ib_forward(params, x, stride=stride)
        out = jax.block_until_ready(out)
        kld = jax.block_until_ready(kld)

        ref_out, ref_kld = reference_forward(params, x, stride=stride)
        Ho = (H - 1) // stride + 1
        assert out.shape == (N, outplanes, Ho, Ho), out.shape
        err = float(jnp.max(jnp.abs(out - ref_out)))
        assert jnp.allclose(out, ref_out, rtol=2e-2, atol=2e-2), (stride, err)
        assert jnp.allclose(kld, ref_kld, rtol=1e-4, atol=1e-4)

    print("KERNEL_OK")
</pallas_src>

<mosaic_0001>
module attributes {stable_mosaic.version = 11 : i64} {
  func.func @_fused_block_kernel(%arg0: i32, %arg1: i32, %arg2: memref<1x18x16x4xbf16, #tpu.memory_space<vmem>>, %arg3: memref<4x24xbf16, #tpu.memory_space<vmem>>, %arg4: memref<1x24xf32, #tpu.memory_space<vmem>>, %arg5: memref<9x24xf32, #tpu.memory_space<vmem>>, %arg6: memref<1x24xf32, #tpu.memory_space<vmem>>, %arg7: memref<24x4xbf16, #tpu.memory_space<vmem>>, %arg8: memref<1x4xf32, #tpu.memory_space<vmem>>, %arg9: memref<1x8x16x4xf32, #tpu.memory_space<vmem>>, %arg10: memref<10x18x24xf32, #tpu.memory_space<vmem>>) attributes {dimension_semantics = [#tpu.dimension_semantics<parallel>, #tpu.dimension_semantics<parallel>], iteration_bounds = array<i64: 2, 2>, scalar_prefetch = 0 : i64, scratch_operands = 1 : i64, tpu.core_type = #tpu.core_type<tc>, window_params = [{transform_indices = @transform_0, window_bounds = array<i64: 1, 18, 16, 4>}, {pipeline_mode = #tpu.pipeline_mode<synchronous>, transform_indices = @transform_1, window_bounds = array<i64: 4, 24>}, {pipeline_mode = #tpu.pipeline_mode<synchronous>, transform_indices = @transform_2, window_bounds = array<i64: 1, 24>}, {pipeline_mode = #tpu.pipeline_mode<synchronous>, transform_indices = @transform_3, window_bounds = array<i64: 9, 24>}, {pipeline_mode = #tpu.pipeline_mode<synchronous>, transform_indices = @transform_4, window_bounds = array<i64: 1, 24>}, {pipeline_mode = #tpu.pipeline_mode<synchronous>, transform_indices = @transform_5, window_bounds = array<i64: 24, 4>}, {pipeline_mode = #tpu.pipeline_mode<synchronous>, transform_indices = @transform_6, window_bounds = array<i64: 1, 4>}, {transform_indices = @transform_7, window_bounds = array<i64: 1, 8, 16, 4>}]} {
    %c8_i32 = arith.constant 8 : i32
    %0 = arith.muli %arg1, %c8_i32 : i32
    %c0 = arith.constant 0 : index
    %1 = arith.index_cast %0 : i32 to index
    %c0_0 = arith.constant 0 : index
    %c0_1 = arith.constant 0 : index
    %2 = vector.load %arg2[%c0, %1, %c0_0, %c0_1] : memref<1x18x16x4xbf16, #tpu.memory_space<vmem>>, vector<1x10x16x4xbf16>
    %3 = vector.shape_cast %2 : vector<1x10x16x4xbf16> to vector<10x16x4xbf16>
    %4 = vector.shape_cast %3 : vector<10x16x4xbf16> to vector<160x4xbf16>
    %c0_2 = arith.constant 0 : index
    %c0_3 = arith.constant 0 : index
    %5 = vector.load %arg3[%c0_2, %c0_3] : memref<4x24xbf16, #tpu.memory_space<vmem>>, vector<4x24xbf16>
    %cst = arith.constant dense<0.000000e+00> : vector<160x24xf32>
    %6 = tpu.matmul %4, %5, %cst {dimension_numbers = #tpu.dot_dimension_numbers<[1], [0], [0], [1], [0, 0, 1, 1], [], []>} : vector<160x4xbf16>, vector<4x24xbf16>, vector<160x24xf32> -> vector<160x24xf32>
    %7 = vector.shape_cast %6 : vector<160x24xf32> to vector<10x16x24xf32>
    %c0_4 = arith.constant 0 : index
    %c0_5 = arith.constant 0 : index
    %8 = vector.load %arg4[%c0_4, %c0_5] : memref<1x24xf32, #tpu.memory_space<vmem>>, vector<1x24xf32>
    %9 = vector.shape_cast %8 : vector<1x24xf32> to vector<1x1x24xf32>
    %10 = vector.broadcast %9 : vector<1x1x24xf32> to vector<10x16x24xf32>
    %11 = arith.addf %7, %10 : vector<10x16x24xf32>
    %cst_6 = arith.constant 0.000000e+00 : f32
    %cst_7 = arith.constant 6.000000e+00 : f32
    %12 = vector.broadcast %cst_6 : f32 to vector<10x16x24xf32>
    %13 = arith.maximumf %12, %11 : vector<10x16x24xf32>
    %14 = vector.broadcast %cst_7 : f32 to vector<10x16x24xf32>
    %15 = arith.minimumf %14, %13 : vector<10x16x24xf32>
    %16 = tpu.iota {dimensions = array<i32: 0>} : vector<10x1x1xi32>
    %c0_i32 = arith.constant 0 : i32
    %17 = arith.cmpi eq, %arg1, %c0_i32 : i32
    %c0_i32_8 = arith.constant 0 : i32
    %18 = vector.broadcast %c0_i32_8 : i32 to vector<10x1x1xi32>
    %19 = arith.cmpi eq, %16, %18 : vector<10x1x1xi32>
    %20 = vector.broadcast %17 : i1 to vector<10x1x1xi1>
    %21 = arith.andi %20, %19 : vector<10x1x1xi1>
    %c1_i32 = arith.constant 1 : i32
    %22 = arith.cmpi eq, %arg1, %c1_i32 : i32
    %c9_i32 = arith.constant 9 : i32
    %23 = vector.broadcast %c9_i32 : i32 to vector<10x1x1xi32>
    %24 = arith.cmpi eq, %16, %23 : vector<10x1x1xi32>
    %25 = vector.broadcast %22 : i1 to vector<10x1x1xi1>
    %26 = arith.andi %25, %24 : vector<10x1x1xi1>
    %27 = arith.ori %21, %26 : vector<10x1x1xi1>
    %cst_9 = arith.constant 0.000000e+00 : f32
    %28 = vector.shape_cast %27 : vector<10x1x1xi1> to vector<10x1x1xi1>
    %29 = vector.broadcast %28 : vector<10x1x1xi1> to vector<10x16x24xi1>
    %30 = vector.broadcast %cst_9 : f32 to vector<10x16x24xf32>
    %31 = arith.select %29, %30, %15 : vector<10x16x24xi1>, vector<10x16x24xf32>
    %c0_10 = arith.constant 0 : index
    %c1 = arith.constant 1 : index
    %c0_11 = arith.constant 0 : index
    %32 = vector.load %arg10[%c0_10, %c1, %c0_11] : memref<10x18x24xf32, #tpu.memory_space<vmem>>, vector<10x16x24xf32>
    tpu.vector_store %arg10[%c0_10, %c1, %c0_11], %31 {strides = array<i32>} : memref<10x18x24xf32, #tpu.memory_space<vmem>>, vector<10x16x24xf32>,
    %cst_12 = arith.constant 0.000000e+00 : f32
    %33 = vector.broadcast %cst_12 : f32 to vector<10x1x24xf32>
    %c0_13 = arith.constant 0 : index
    %c0_14 = arith.constant 0 : index
    %c0_15 = arith.constant 0 : index
    %34 = vector.load %arg10[%c0_13, %c0_14, %c0_15] : memref<10x18x24xf32, #tpu.memory_space<vmem>>, vector<10x1x24xf32>
    tpu.vector_store %arg10[%c0_13, %c0_14, %c0_15], %33 {strides = array<i32>} : memref<10x18x24xf32, #tpu.memory_space<vmem>>, vector<10x1x24xf32>,
    %c0_16 = arith.constant 0 : index
    %c17 = arith.constant 17 : index
    %c0_17 = arith.constant 0 : index
    %35 = vector.load %arg10[%c0_16, %c17, %c0_17] : memref<10x18x24xf32, #tpu.memory_space<vmem>>, vector<10x1x24xf32>
    tpu.vector_store %arg10[%c0_16, %c17, %c0_17], %33 {strides = array<i32>} : memref<10x18x24xf32, #tpu.memory_space<vmem>>, vector<10x1x24xf32>,
    %c0_18 = arith.constant 0 : index
    %c0_19 = arith.constant 0 : index
    %c0_20 = arith.constant 0 : index
    %36 = vector.load %arg10[%c0_18, %c0_19, %c0_20] : memref<10x18x24xf32, #tpu.memory_space<vmem>>, vector<10x18x24xf32>
    %c0_21 = arith.constant 0 : index
    %c0_22 = arith.constant 0 : index
    %37 = vector.load %arg5[%c0_21, %c0_22] : memref<9x24xf32, #tpu.memory_space<vmem>>, vector<9x24xf32>
    %cst_23 = arith.constant 0.000000e+00 : f32
    %38 = vector.broadcast %cst_23 : f32 to vector<8x16x24xf32>
    %39 = vector.extract_strided_slice %36 {offsets = [0, 0, 0], sizes = [8, 16, 24], strides = [1, 1, 1]} : vector<10x18x24xf32> to vector<8x16x24xf32>
    %40 = vector.extract_strided_slice %37 {offsets = [0, 0], sizes = [1, 24], strides = [1, 1]} : vector<9x24xf32> to vector<1x24xf32>
    %41 = vector.shape_cast %40 : vector<1x24xf32> to vector<24xf32>
    %42 = vector.shape_cast %41 : vector<24xf32> to vector<1x1x24xf32>
    %43 = vector.broadcast %42 : vector<1x1x24xf32> to vector<8x16x24xf32>
    %44 = arith.mulf %39, %43 : vector<8x16x24xf32>
    %45 = arith.addf %38, %44 : vector<8x16x24xf32>
    %46 = vector.extract_strided_slice %36 {offsets = [0, 1, 0], sizes = [8, 16, 24], strides = [1, 1, 1]} : vector<10x18x24xf32> to vector<8x16x24xf32>
    %47 = vector.extract_strided_slice %37 {offsets = [1, 0], sizes = [1, 24], strides = [1, 1]} : vector<9x24xf32> to vector<1x24xf32>
    %48 = vector.shape_cast %47 : vector<1x24xf32> to vector<24xf32>
    %49 = vector.shape_cast %48 : vector<24xf32> to vector<1x1x24xf32>
    %50 = vector.broadcast %49 : vector<1x1x24xf32> to vector<8x16x24xf32>
    %51 = arith.mulf %46, %50 : vector<8x16x24xf32>
    %52 = arith.addf %45, %51 : vector<8x16x24xf32>
    %53 = vector.extract_strided_slice %36 {offsets = [0, 2, 0], sizes = [8, 16, 24], strides = [1, 1, 1]} : vector<10x18x24xf32> to vector<8x16x24xf32>
    %54 = vector.extract_strided_slice %37 {offsets = [2, 0], sizes = [1, 24], strides = [1, 1]} : vector<9x24xf32> to vector<1x24xf32>
    %55 = vector.shape_cast %54 : vector<1x24xf32> to vector<24xf32>
    %56 = vector.shape_cast %55 : vector<24xf32> to vector<1x1x24xf32>
    %57 = vector.broadcast %56 : vector<1x1x24xf32> to vector<8x16x24xf32>
    %58 = arith.mulf %53, %57 : vector<8x16x24xf32>
    %59 = arith.addf %52, %58 : vector<8x16x24xf32>
    %60 = vector.extract_strided_slice %36 {offsets = [1, 0, 0], sizes = [8, 16, 24], strides = [1, 1, 1]} : vector<10x18x24xf32> to vector<8x16x24xf32>
    %61 = vector.extract_strided_slice %37 {offsets = [3, 0], sizes = [1, 24], strides = [1, 1]} : vector<9x24xf32> to vector<1x24xf32>
    %62 = vector.shape_cast %61 : vector<1x24xf32> to vector<24xf32>
    %63 = vector.shape_cast %62 : vector<24xf32> to vector<1x1x24xf32>
    %64 = vector.broadcast %63 : vector<1x1x24xf32> to vector<8x16x24xf32>
    %65 = arith.mulf %60, %64 : vector<8x16x24xf32>
    %66 = arith.addf %59, %65 : vector<8x16x24xf32>
    %67 = vector.extract_strided_slice %36 {offsets = [1, 1, 0], sizes = [8, 16, 24], strides = [1, 1, 1]} : vector<10x18x24xf32> to vector<8x16x24xf32>
    %68 = vector.extract_strided_slice %37 {offsets = [4, 0], sizes = [1, 24], strides = [1, 1]} : vector<9x24xf32> to vector<1x24xf32>
    %69 = vector.shape_cast %68 : vector<1x24xf32> to vector<24xf32>
    %70 = vector.shape_cast %69 : vector<24xf32> to vector<1x1x24xf32>
    %71 = vector.broadcast %70 : vector<1x1x24xf32> to vector<8x16x24xf32>
    %72 = arith.mulf %67, %71 : vector<8x16x24xf32>
    %73 = arith.addf %66, %72 : vector<8x16x24xf32>
    %74 = vector.extract_strided_slice %36 {offsets = [1, 2, 0], sizes = [8, 16, 24], strides = [1, 1, 1]} : vector<10x18x24xf32> to vector<8x16x24xf32>
    %75 = vector.extract_strided_slice %37 {offsets = [5, 0], sizes = [1, 24], strides = [1, 1]} : vector<9x24xf32> to vector<1x24xf32>
    %76 = vector.shape_cast %75 : vector<1x24xf32> to vector<24xf32>
    %77 = vector.shape_cast %76 : vector<24xf32> to vector<1x1x24xf32>
    %78 = vector.broadcast %77 : vector<1x1x24xf32> to vector<8x16x24xf32>
    %79 = arith.mulf %74, %78 : vector<8x16x24xf32>
    %80 = arith.addf %73, %79 : vector<8x16x24xf32>
    %81 = vector.extract_strided_slice %36 {offsets = [2, 0, 0], sizes = [8, 16, 24], strides = [1, 1, 1]} : vector<10x18x24xf32> to vector<8x16x24xf32>
    %82 = vector.extract_strided_slice %37 {offsets = [6, 0], sizes = [1, 24], strides = [1, 1]} : vector<9x24xf32> to vector<1x24xf32>
    %83 = vector.shape_cast %82 : vector<1x24xf32> to vector<24xf32>
    %84 = vector.shape_cast %83 : vector<24xf32> to vector<1x1x24xf32>
    %85 = vector.broadcast %84 : vector<1x1x24xf32> to vector<8x16x24xf32>
    %86 = arith.mulf %81, %85 : vector<8x16x24xf32>
    %87 = arith.addf %80, %86 : vector<8x16x24xf32>
    %88 = vector.extract_strided_slice %36 {offsets = [2, 1, 0], sizes = [8, 16, 24], strides = [1, 1, 1]} : vector<10x18x24xf32> to vector<8x16x24xf32>
    %89 = vector.extract_strided_slice %37 {offsets = [7, 0], sizes = [1, 24], strides = [1, 1]} : vector<9x24xf32> to vector<1x24xf32>
    %90 = vector.shape_cast %89 : vector<1x24xf32> to vector<24xf32>
    %91 = vector.shape_cast %90 : vector<24xf32> to vector<1x1x24xf32>
    %92 = vector.broadcast %91 : vector<1x1x24xf32> to vector<8x16x24xf32>
    %93 = arith.mulf %88, %92 : vector<8x16x24xf32>
    %94 = arith.addf %87, %93 : vector<8x16x24xf32>
    %95 = vector.extract_strided_slice %36 {offsets = [2, 2, 0], sizes = [8, 16, 24], strides = [1, 1, 1]} : vector<10x18x24xf32> to vector<8x16x24xf32>
    %96 = vector.extract_strided_slice %37 {offsets = [8, 0], sizes = [1, 24], strides = [1, 1]} : vector<9x24xf32> to vector<1x24xf32>
    %97 = vector.shape_cast %96 : vector<1x24xf32> to vector<24xf32>
    %98 = vector.shape_cast %97 : vector<24xf32> to vector<1x1x24xf32>
    %99 = vector.broadcast %98 : vector<1x1x24xf32> to vector<8x16x24xf32>
    %100 = arith.mulf %95, %99 : vector<8x16x24xf32>
    %101 = arith.addf %94, %100 : vector<8x16x24xf32>
    %c0_24 = arith.constant 0 : index
    %c0_25 = arith.constant 0 : index
    %102 = vector.load %arg6[%c0_24, %c0_25] : memref<1x24xf32, #tpu.memory_space<vmem>>, vector<1x24xf32>
    %103 = vector.shape_cast %102 : vector<1x24xf32> to vector<1x1x24xf32>
    %104 = vector.broadcast %103 : vector<1x1x24xf32> to vector<8x16x24xf32>
    %105 = arith.addf %101, %104 : vector<8x16x24xf32>
    %cst_26 = arith.constant 0.000000e+00 : f32
    %cst_27 = arith.constant 6.000000e+00 : f32
    %106 = vector.broadcast %cst_26 : f32 to vector<8x16x24xf32>
    %107 = arith.maximumf %106, %105 : vector<8x16x24xf32>
    %108 = vector.broadcast %cst_27 : f32 to vector<8x16x24xf32>
    %109 = arith.minimumf %108, %107 : vector<8x16x24xf32>
    %110 = arith.truncf %109 : vector<8x16x24xf32> to vector<8x16x24xbf16>
    %111 = vector.shape_cast %110 : vector<8x16x24xbf16> to vector<128x24xbf16>
    %c0_28 = arith.constant 0 : index
    %c0_29 = arith.constant 0 : index
    %112 = vector.load %arg7[%c0_28, %c0_29] : memref<24x4xbf16, #tpu.memory_space<vmem>>, vector<24x4xbf16>
    %cst_30 = arith.constant dense<0.000000e+00> : vector<128x4xf32>
    %113 = tpu.matmul %111, %112, %cst_30 {dimension_numbers = #tpu.dot_dimension_numbers<[1], [0], [0], [1], [0, 0, 1, 1], [], []>} : vector<128x24xbf16>, vector<24x4xbf16>, vector<128x4xf32> -> vector<128x4xf32>
    %114 = vector.shape_cast %113 : vector<128x4xf32> to vector<8x16x4xf32>
    %c0_31 = arith.constant 0 : index
    %c0_32 = arith.constant 0 : index
    %115 = vector.load %arg8[%c0_31, %c0_32] : memref<1x4xf32, #tpu.memory_space<vmem>>, vector<1x4xf32>
    %116 = vector.shape_cast %115 : vector<1x4xf32> to vector<1x1x4xf32>
    %117 = vector.broadcast %116 : vector<1x1x4xf32> to vector<8x16x4xf32>
    %118 = arith.addf %114, %117 : vector<8x16x4xf32>
    %c8_i32_33 = arith.constant 8 : i32
    %119 = arith.muli %arg1, %c8_i32_33 : i32
    %c1_i32_34 = arith.constant 1 : i32
    %120 = arith.addi %119, %c1_i32_34 : i32
    %c0_35 = arith.constant 0 : index
    %121 = arith.index_cast %120 : i32 to index
    %c0_36 = arith.constant 0 : index
    %c0_37 = arith.constant 0 : index
    %122 = vector.load %arg2[%c0_35, %121, %c0_36, %c0_37] : memref<1x18x16x4xbf16, #tpu.memory_space<vmem>>, vector<1x8x16x4xbf16>
    %123 = vector.shape_cast %122 : vector<1x8x16x4xbf16> to vector<8x16x4xbf16>
    %124 = arith.extf %123 : vector<8x16x4xbf16> to vector<8x16x4xf32>
    %125 = arith.addf %118, %124 : vector<8x16x4xf32>
    %126 = vector.shape_cast %125 : vector<8x16x4xf32> to vector<1x8x16x4xf32>
    %c0_38 = arith.constant 0 : index
    %c0_39 = arith.constant 0 : index
    %c0_40 = arith.constant 0 : index
    %c0_41 = arith.constant 0 : index
    %127 = vector.load %arg9[%c0_38, %c0_39, %c0_40, %c0_41] : memref<1x8x16x4xf32, #tpu.memory_space<vmem>>, vector<1x8x16x4xf32>
    tpu.vector_store %arg9[%c0_38, %c0_39, %c0_40, %c0_41], %126 {strides = array<i32>} : memref<1x8x16x4xf32, #tpu.memory_space<vmem>>, vector<1x8x16x4xf32>,
    return
  }
  func.func @transform_0(%arg0: i32, %arg1: i32) -> (i32, i32, i32, i32) {
    %c0_i32 = arith.constant 0 : i32
    %c0_i32_0 = arith.constant 0 : i32
    %c0_i32_1 = arith.constant 0 : i32
    %c0_i32_2 = arith.constant 0 : i32
    return %arg0, %c0_i32, %c0_i32_0, %c0_i32_1 : i32, i32, i32, i32
  }
  func.func @transform_1(%arg0: i32, %arg1: i32) -> (i32, i32) {
    %c0_i32 = arith.constant 0 : i32
    %c0_i32_0 = arith.constant 0 : i32
    %c0_i32_1 = arith.constant 0 : i32
    return %c0_i32, %c0_i32_0 : i32, i32
  }
  func.func @transform_2(%arg0: i32, %arg1: i32) -> (i32, i32) {
    %c0_i32 = arith.constant 0 : i32
    %c0_i32_0 = arith.constant 0 : i32
    %c0_i32_1 = arith.constant 0 : i32
    return %c0_i32, %c0_i32_0 : i32, i32
  }
  func.func @transform_3(%arg0: i32, %arg1: i32) -> (i32, i32) {
    %c0_i32 = arith.constant 0 : i32
    %c0_i32_0 = arith.constant 0 : i32
    %c0_i32_1 = arith.constant 0 : i32
    return %c0_i32, %c0_i32_0 : i32, i32
  }
  func.func @transform_4(%arg0: i32, %arg1: i32) -> (i32, i32) {
    %c0_i32 = arith.constant 0 : i32
    %c0_i32_0 = arith.constant 0 : i32
    %c0_i32_1 = arith.constant 0 : i32
    return %c0_i32, %c0_i32_0 : i32, i32
  }
  func.func @transform_5(%arg0: i32, %arg1: i32) -> (i32, i32) {
    %c0_i32 = arith.constant 0 : i32
    %c0_i32_0 = arith.constant 0 : i32
    %c0_i32_1 = arith.constant 0 : i32
    return %c0_i32, %c0_i32_0 : i32, i32
  }
  func.func @transform_6(%arg0: i32, %arg1: i32) -> (i32, i32) {
    %c0_i32 = arith.constant 0 : i32
    %c0_i32_0 = arith.constant 0 : i32
    %c0_i32_1 = arith.constant 0 : i32
    return %c0_i32, %c0_i32_0 : i32, i32
  }
  func.func @transform_7(%arg0: i32, %arg1: i32) -> (i32, i32, i32, i32) {
    %c0_i32 = arith.constant 0 : i32
    %c0_i32_0 = arith.constant 0 : i32
    %c0_i32_1 = arith.constant 0 : i32
    return %arg0, %arg1, %c0_i32, %c0_i32_0 : i32, i32, i32, i32
  }
}

</mosaic_0001>

<bundles_post_ra>
// kernel: tpu_custom_call.1
= control target key start
LH: loop header
LB: loop body
LE: loop exit
PB: predicated region body
PF: predicated region fallthrough
CT: control target
= control target key end

     0   :  { %s2254_s24 = smov 0   ;;  %s2256_s25 = smov 0   ;;  %s3088_s0 = inlined_call_operand.vmem [shape: bf16[2,18,16,4], index: 0, kind: input, shape index: {}]   ;;  %s3089_s1 = inlined_call_operand.vmem [shape: bf16[4,24], index: 1, kind: input, shape index: {}]   ;;  %s3090_s2 = inlined_call_operand.vmem [shape: f32[1,24], index: 2, kind: input, shape index: {}]   ;;  %s3091_s3 = inlined_call_operand.vmem [shape: f32[9,24], index: 3, kind: input, shape index: {}]   ;;  %s3092_s4 = inlined_call_operand.vmem [shape: f32[1,24], index: 4, kind: input, shape index: {}]   ;;  %s3093_s5 = inlined_call_operand.vmem [shape: bf16[24,4], index: 5, kind: input, shape index: {}]   ;;  %s3094_s6 = inlined_call_operand.vmem [shape: f32[1,4], index: 6, kind: input, shape index: {}]   ;;  %s3095_s7 = inlined_call_operand.vmem [shape: f32[2,16,16,4], index: 7, kind: output, shape index: {}]  }
   0x1   :  { %s2258_s26 = smov 0   ;;  %s2260_s27 = smov 0  }
   0x2   :  { %s2262_s28 = smov 0  }
   0x3 LB: > { %s26_s29 = sadd.s32 1, %s2203_s26  ;;  %s29_s30 = sadd.s32 1, %s2207_s27  ;;  %s2211_s28 = sphi %s2262_s28, %s17_s28   ;;  %s2207_s27 = sphi %s2260_s27, %s3103_s27   ;;  %s2203_s26 = sphi %s2258_s26, %s3102_s26   ;;  %s2199_s25 = sphi %s2256_s25, %s3101_s25   ;;  %s2195_s24 = sphi %s2254_s24, %s3100_s24  }
   0x4   : > { %p27_p0 = scmp.ge.s32.totalorder %s26_s29, 2  ;;  %p1946_p1 = scmp.ge.s32.totalorder %s2211_s28, 1 }
   0x5   : > { %p251_p2 = scmp.lt.s32.totalorder %s2211_s28, 5 }
   0x6   : > { %s3105_s29 = smov (%p27_p0, %s26_s29), 0  ;;  %s3107_s30 = smov (!%p27_p0, %s29_s30), %s2207_s27 }
   0x7   : > { %p252_p3 = pnand %p1946_p1, %p251_p2  ;;  %p31_p4 = scmp.ge.s32.totalorder %s3107_s30, 2 }
   0x8   : > { %v329_v0 = vld [vmem:[%s3089_s1] sm:$0x3] (!%p252_p3)  ;;  %vm411_vm0 = vcmask (!%p252_p3), 1041408   ;;  %p288_p5 = scmp.lt.s32.totalorder (!%p252_p3), %s2199_s25, 1  ;;  %s2010_s11 = sshll.u32 (!%p252_p3), %s2195_s24, 6  ;;  %vm380_vm1 = vcmask (!%p252_p3), 31744   ;;  %v701_v16 = vlaneseq (!%p252_p3) }
   0x9   : > { %s3109_s30 = smov (%p31_p4, %s3107_s30), 0  ;;  %255 = sbr.rel (%p252_p3) target bundleno = 643 (0x283), region = 48 }
   0xa   : > { %2115 = vmatprep.subr.msk.bf16.mxu0 (!%p252_p3), %vm411_vm0, %v329_v0  ;;  %v413_v1 = vsel (!%p252_p3), %vm411_vm0, %v329_v0, 0  ;;  %vm648_vm2 = vcmask (!%p252_p3), 188416   ;;  %v2213_v12 = vmov (!%p252_p3), 0.0   ;;  %v2169_v13 = vld [vmem:[%s3093_s5] sm:$0xff] (!%p252_p3)   ;;  %v2170_v14 = vld [vmem:[%s3093_s5 + $0x8] ss:$0 sps:$4 sm:$0xff] (!%p252_p3)  }
   0xb   : > { %2074 = vmatpush3.bf16.msra.mxu0 (!%p252_p3), %v413_v1  ;;  %652 = vst.msk [vmem:[#allocation2 + $0x48] sm:$0x1] (!%p252_p3), %vm648_vm2, %v2213_v12  ;;  %649 = vst.msk [vmem:[#allocation2] sm:$0x1] (!%p252_p3), %vm648_vm2, %v2213_v12  ;;  %2095 = vmatprep.subr.bf16.mxu1 (!%p252_p3), %v2169_v13  ;;  %vm1654_vm3 = vcmask (!%p252_p3), 1043456   ;;  %p595_p6 = scmp.eq.s32.totalorder (!%p252_p3), %s2195_s24, 0 }
   0xc   : > { %650 = vst.msk [vmem:[#allocation2 + $0x18] sm:$0x1] (!%p252_p3), %vm648_vm2, %v2213_v12  ;;  %651 = vst.msk [vmem:[#allocation2 + $0x30] sm:$0x1] (!%p252_p3), %vm648_vm2, %v2213_v12  ;;  %2096 = vmatpush3.bf16.msra.mxu1 (!%p252_p3), %v2169_v13  ;;  %v1656_v15 = vsel (!%p252_p3), %vm1654_vm3, %v2170_v14, 0  ;;  %v702_v21 = vshrl.u32 (!%p252_p3), %v701_v16, 7 }
   0xd   : > { %653 = vst.msk [vmem:[#allocation2 + $0x60] sm:$0x1] (!%p252_p3), %vm648_vm2, %v2213_v12  ;;  %654 = vst.msk [vmem:[#allocation2 + $0x78] sm:$0x1] (!%p252_p3), %vm648_vm2, %v2213_v12  ;;  %2116 = vmatprep.subr.msk.bf16.mxu1 (!%p252_p3), %vm1654_vm3, %v2170_v14  ;;  %v2348_v17 = vld [vmem:[%s3090_s2] ss:$0 sm:$0xff] (!%p252_p3) }
   0xe   : > { %655 = vst.msk [vmem:[#allocation2 + $0x90] sm:$0x1] (!%p252_p3), %vm648_vm2, %v2213_v12  ;;  %656 = vst.msk [vmem:[#allocation2 + $0xa8] sm:$0x1] (!%p252_p3), %vm648_vm2, %v2213_v12  ;;  %vm627_vm4 = vcmask (!%p252_p3), 195584   ;;  %v703_v33 = vsub.s32 (!%p252_p3), 0, %v702_v21 }
   0xf   : > { %657 = vst.msk [vmem:[#allocation2 + $0xc0] sm:$0x1] (!%p252_p3), %vm648_vm2, %v2213_v12  ;;  %658 = vst.msk [vmem:[#allocation2 + $0xd8] sm:$0x1] (!%p252_p3), %vm648_vm2, %v2213_v12  ;;  %p599_p7 = scmp.eq.s32.totalorder (!%p252_p3), %s2195_s24, 1  ;;  %v699_v36 = vld [vmem:[%s3091_s3] sm:$0xff] (!%p252_p3) }
  0x10   : > { %s3111_s25 = smov (!%p288_p5, %s2199_s25), 1  ;;  %659 = vst.msk [vmem:[#allocation2 + $0x11] sm:$0x1] %vm648_vm2, %v2213_v12  ;;  %660 = vst.msk [vmem:[#allocation2 + $0x29] sm:$0x1] %vm648_vm2, %v2213_v12  ;;  %2098 = vmatpush3.bf16.msra.mxu1 %v1656_v15  ;;  %v989_v37 = vsub.s32 3, %v702_v21  ;;  %v2368_v48 = vrot.slane %v699_v36, %v703_v33 }
  0x11   : > { %s2117_s10 = smul.u32 144, %s3111_s25  ;;  %661 = vst.msk [vmem:[#allocation2 + $0x41] sm:$0x1] %vm648_vm2, %v2213_v12  ;;  %662 = vst.msk [vmem:[#allocation2 + $0x59] sm:$0x1] %vm648_vm2, %v2213_v12  ;;  %v1025_v39 = vsub.s32 4, %v702_v21 }
  0x12   : > { %663 = vst.msk [vmem:[#allocation2 + $0x71] sm:$0x1] %vm648_vm2, %v2213_v12  ;;  %664 = vst.msk [vmem:[#allocation2 + $0x89] sm:$0x1] %vm648_vm2, %v2213_v12  ;;  %s596_s22 = scalar_select %p595_p6, 1, 0  ;;  %v2377_v53 = vrot.slane %v699_v36, %v989_v37 }
  0x13   : > { %s292_s14 = scalar_lea.vmem %s3088_s0, %s2117_s10  ;;  %665 = vst.msk [vmem:[#allocation2 + $0xa1] sm:$0x1] %vm648_vm2, %v2213_v12  ;;  %666 = vst.msk [vmem:[#allocation2 + $0xb9] sm:$0x1] %vm648_vm2, %v2213_v12  ;;  %v1149_v40 = vsub.s32 5, %v702_v21  ;;  %v739_v44 = vsub.s32 1, %v702_v21  ;;  %v2381_v58 = vrot.slane %v699_v36, %v1025_v39 }
  0x14   : > { %s2296_s15 = scalar_lea.vmem %s292_s14, %s2010_s11  ;;  %667 = vst.msk [vmem:[#allocation2 + $0xd1] sm:$0x1] %vm648_vm2, %v2213_v12  ;;  %668 = vst.msk [vmem:[#allocation2 + $0xe9] sm:$0x1] %vm648_vm2, %v2213_v12  ;;  %v597_v23 = vstv %s596_s22  ;;  %v864_v45 = vsub.s32 2, %v702_v21  ;;  %v1273_v49 = vsub.s32 6, %v702_v21 }
  0x15   : > { %v2159_v2 = vld [vmem:[%s2296_s15] sm:$0xff]   ;;  %v2160_v3 = vld [vmem:[%s2296_s15 + $0x8] sm:$0xff]   ;;  %v2161_v4 = vld [vmem:[%s2296_s15 + $0x10] sm:$0xff]   ;;  %vm2354_vm5 = vcmp.eq.s32.totalorder %v597_v23, 1  ;;  %s2375_s9 = scalar_select %p599_p7, 1, 0  ;;  %v2383_v59 = vrot.slane %v699_v36, %v1149_v40  ;;  %v2386_v62 = vrot.slane %v699_v36, %v739_v44 }
  0x16   : > { %2075 = vmatprep.mubr.msk.bf16.mxu0 %vm380_vm1, %v2159_v2  ;;  %v2162_v5 = vld [vmem:[%s2296_s15 + $0x18] sm:$0xff]   ;;  %v2163_v6 = vld [vmem:[%s2296_s15 + $0x20] sm:$0xff]   ;;  %v2164_v7 = vld [vmem:[%s2296_s15 + $0x28] sm:$0xff]   ;;  %v1309_v54 = vsub.s32 7, %v702_v21  ;;  %v2388_v63 = vrot.slane %v699_v36, %v864_v45  ;;  %v2390_v2 = vrot.slane %v699_v36, %v1273_v49  ;;  %vm789_vm6 = vcmask 1046528   ;;  %s1948_s19 = sshll.u32 %s2195_s24, 3 }
  0x17   : > { %2076 = vmatmul.mubr.msk.bf16.vlgmr.msra.gmra.mrb[0].mxu0 %vm380_vm1, %v2160_v3  ;;  %v2165_v8 = vld [vmem:[%s2296_s15 + $0x30] sm:$0xff]   ;;  %v2166_v9 = vld [vmem:[%s2296_s15 + $0x38] sm:$0xff]   ;;  %v2167_v10 = vld [vmem:[%s2296_s15 + $0x40] sm:$0xff]   ;;  %vm914_vm7 = vcmask 1045504   ;;  %p296_p8 = scmp.lt.s32.totalorder %s1948_s19, 15  ;;  %s1950_s21 = sshll.u32 %s3111_s25, 5 }
  0x18   : > { %2079 = vmatprep.mubr.msk.bf16.mxu0 %vm380_vm1, %v2161_v4  ;;  %v2168_v11 = vld [vmem:[%s2296_s15 + $0x48] sm:$0xff]  }
  0x19   : > { %s3113_s19 = smov (!%p296_p8, %s1948_s19), 15 }
  0x1a   : > { %s1949_s20 = sshll.u32 %s3113_s19, 1 }
  0x1b   : > { %s300_s22 = sadd.s32 %s1950_s21, %s1949_s20 }
  0x1f   : > { %2080 = vmatmul.mubr.msk.bf16.gmra.mrb[4].mxu0 %vm380_vm1, %v2162_v5  ;;  %v601_v5 = vstv %s2375_s9  ;;  %s1951_s9 = sshll.u32 %s300_s22, 3 }
  0x20   : > { %2083 = vmatprep.mubr.msk.bf16.mxu0 %vm380_vm1, %v2163_v6  ;;  %vm2467_vm8 = vcmp.eq.s32.totalorder %v601_v5, 1  ;;  %s3018_s25 = scalar_lea.vmem %s3095_s7, %s1951_s9 }
  0x27   : > { %2084 = vmatmul.mubr.msk.bf16.gmra.mrb[8].mxu0 %vm380_vm1, %v2164_v7  ;;  %v2393_v7 = vrot.slane %v699_v36, %v1309_v54 }
  0x28   : > { %2087 = vmatprep.mubr.msk.bf16.mxu0 %vm380_vm1, %v2165_v8 }
  0x2f   : > { %2088 = vmatmul.mubr.msk.bf16.gmra.mrb[12].mxu0 %vm380_vm1, %v2166_v9 }
  0x30   : > { %2091 = vmatprep.mubr.msk.bf16.mxu0 %vm380_vm1, %v2167_v10 }
  0x37   : > { %2092 = vmatmul.mubr.msk.bf16.gmra.mrb[16].mxu0 %vm380_vm1, %v2168_v11 }
  0xea   : > { %v2077_v18 = vpop.f32.mrb[0].mxu0 }
  0xeb   : > { %v537_v19 = vadd.f32 %v2077_v18, %v2348_v17  ;;  %v449_v20 = vpop.f32.mrb[1].mxu0 }
  0xec   : > { %v535_v22 = vadd.f32 %v2348_v17, %v449_v20  ;;  %v2078_v24 = vpop.f32.mrb[2].mxu0 }
  0xed   : > { %v557_v25 = vmax.f32 %v537_v19, 0.0  ;;  %v538_v26 = vadd.f32 %v2078_v24, %v2348_v17  ;;  %v452_v27 = vpop.f32.mrb[3].mxu0 }
  0xee   : > { %v555_v28 = vmax.f32 %v535_v22, 0.0  ;;  %v536_v29 = vadd.f32 %v2348_v17, %v452_v27 }
  0xef   : > { %v577_v30 = vmin.f32 %v557_v25, 6.0  ;;  %v558_v32 = vmax.f32 %v538_v26, 0.0 }
  0xf0   : > { %v575_v34 = vmin.f32 %v555_v28, 6.0  ;;  %v556_v35 = vmax.f32 %v536_v29, 0.0 }
  0xf1   : > { %630 = vst.msk [vmem:[#allocation2 + $0x19] sm:$0xff] %vm627_vm4, %v577_v30  ;;  %v578_v38 = vmin.f32 %v558_v32, 6.0 }
  0xf2   : > { %v607_v41 = vsel %vm2354_vm5, 0.0, %v575_v34  ;;  %v576_v42 = vmin.f32 %v556_v35, 6.0  ;;  %v2081_v43 = vpop.f32.mrb[4].mxu0 }
  0xf3   : > { %628 = vst.msk [vmem:[#allocation2 + $0x1] sm:$0xff] %vm627_vm4, %v607_v41  ;;  %631 = vst.msk [vmem:[#allocation2 + $0x21] sm:$0xff] %vm627_vm4, %v578_v38  ;;  %v541_v46 = vadd.f32 %v2081_v43, %v2348_v17  ;;  %v465_v47 = vpop.f32.mrb[5].mxu0 }
  0xf4   : > { %v608_v50 = vsel %vm2354_vm5, 0.0, %v576_v42  ;;  %v539_v51 = vadd.f32 %v2348_v17, %v465_v47  ;;  %v2082_v52 = vpop.f32.mrb[6].mxu0 }
  0xf5   : > { %629 = vst.msk [vmem:[#allocation2 + $0x9] sm:$0xff] %vm627_vm4, %v608_v50  ;;  %v561_v55 = vmax.f32 %v541_v46, 0.0  ;;  %v542_v56 = vadd.f32 %v2082_v52, %v2348_v17  ;;  %v468_v57 = vpop.f32.mrb[7].mxu0 }
  0xf6   : > { %v559_v60 = vmax.f32 %v539_v51, 0.0  ;;  %v540_v61 = vadd.f32 %v2348_v17, %v468_v57 }
  0xf7   : > { %v581_v0 = vmin.f32 %v561_v55, 6.0  ;;  %v562_v1 = vmax.f32 %v542_v56, 0.0 }
  0xf8   : > { %v579_v3 = vmin.f32 %v559_v60, 6.0  ;;  %v560_v4 = vmax.f32 %v540_v61, 0.0  ;;  %v672_v6 = vld [vmem:[#allocation2 + $0x18] sm:$0xff] }
  0xf9   : > { %634 = vst.msk [vmem:[#allocation2 + $0x49] sm:$0xff] %vm627_vm4, %v581_v0  ;;  %v582_v8 = vmin.f32 %v562_v1, 6.0  ;;  %v2397_v9 = vmul.f32 %v2377_v53, %v672_v6  ;;  %v2400_v10 = vmul.f32 %v2381_v58, %v672_v6  ;;  %v2403_v11 = vmul.f32 %v2383_v59, %v672_v6 }
  0xfa   : > { %632 = vst.msk [vmem:[#allocation2 + $0x31] sm:$0xff] %vm627_vm4, %v579_v3  ;;  %v580_v12 = vmin.f32 %v560_v4, 6.0  ;;  %v2085_v13 = vpop.f32.mrb[8].mxu0  ;;  %v669_v14 = vld [vmem:[#allocation2] sm:$0xff]  ;;  %v2408_v16 = vld [vmem:[#allocation2 + $0x28] sm:$0x3]  ;;  %v2411_v18 = vmul.f32 %v2368_v48, %v672_v6  ;;  %v2414_v19 = vmul.f32 %v2386_v62, %v672_v6  ;;  %v2417_v20 = vmul.f32 %v2388_v63, %v672_v6 }
  0xfb   : > { %v2406_v15 = vld [vmem:[#allocation2 + $0x20] sm:$0xff]  ;;  %635 = vst.msk [vmem:[#allocation2 + $0x51] sm:$0xff] %vm627_vm4, %v582_v8  ;;  %v545_v21 = vadd.f32 %v2085_v13, %v2348_v17  ;;  %v481_v22 = vpop.f32.mrb[9].mxu0  ;;  %v705_v23 = vmul.f32 %v2368_v48, %v669_v14  ;;  %v741_v24 = vmul.f32 %v2386_v62, %v669_v14  ;;  %v2425_v25 = vmul.f32 %v2386_v62, %v2408_v16 }
  0xfc   : > { %633 = vst.msk [vmem:[#allocation2 + $0x39] sm:$0xff] %vm627_vm4, %v580_v12  ;;  %v543_v26 = vadd.f32 %v2348_v17, %v481_v22  ;;  %v2086_v27 = vpop.f32.mrb[10].mxu0  ;;  %v670_v28 = vld [vmem:[#allocation2 + $0x8] sm:$0xff]  ;;  %v671_v29 = vld [vmem:[#allocation2 + $0x10] sm:$0x3]  ;;  %v866_v30 = vmul.f32 %v2388_v63, %v669_v14  ;;  %v2432_v31 = vmul.f32 %v2388_v63, %v2408_v16  ;;  %v992_v32 = vmul.f32 %v2377_v53, %v2406_v15 }
  0xfd   : > { %v565_v33 = vmax.f32 %v545_v21, 0.0  ;;  %v546_v34 = vadd.f32 %v2086_v27, %v2348_v17  ;;  %v484_v35 = vpop.f32.mrb[11].mxu0  ;;  %v706_v36 = vmul.f32 %v2368_v48, %v670_v28  ;;  %v742_v37 = vmul.f32 %v2386_v62, %v670_v28 }
  0xfe   : > { %v563_v38 = vmax.f32 %v543_v26, 0.0  ;;  %v544_v39 = vadd.f32 %v2348_v17, %v484_v35  ;;  %v743_v40 = vmul.f32 %v2386_v62, %v671_v29  ;;  %v790_v41 = vrot.slane %v741_v24, 1 }
  0xff   : > { %v585_v42 = vmin.f32 %v565_v33, 6.0  ;;  %v566_v43 = vmax.f32 %v546_v34, 0.0  ;;  %v791_v44 = vrot.slane %v742_v37, 1  ;;  %v798_v45 = vrot.slane %v2425_v25, 1 }
 0x100   : > { %v583_v46 = vmin.f32 %v563_v38, 6.0  ;;  %v564_v47 = vmax.f32 %v544_v39, 0.0  ;;  %v793_v49 = vrot.slane %v743_v40, 1  ;;  %v867_v50 = vmul.f32 %v2388_v63, %v670_v28 }
 0x101   : > { %638 = vst.msk [vmem:[#allocation2 + $0x79] sm:$0xff] %vm627_vm4, %v585_v42  ;;  %v586_v51 = vmin.f32 %v566_v43, 6.0  ;;  %v792_v52 = vsel %vm789_vm6, %v790_v41, %v791_v44  ;;  %v868_v54 = vmul.f32 %v2388_v63, %v671_v29  ;;  %v915_v55 = vrot.slane %v866_v30, 2  ;;  %v2472_v39 = vld [vmem:[#allocation2 + $0x30] sm:$0xff] }
 0x102   : > { %636 = vst.msk [vmem:[#allocation2 + $0x61] sm:$0xff] %vm627_vm4, %v583_v46  ;;  %v584_v56 = vmin.f32 %v564_v47, 6.0  ;;  %v2089_v57 = vpop.f32.mrb[12].mxu0  ;;  %v794_v60 = vsel %vm789_vm6, %v791_v44, %v793_v49  ;;  %v846_v61 = vadd.f32 %v792_v52, %v705_v23  ;;  %v916_v0 = vrot.slane %v867_v50, 2 }
 0x103   : > { %639 = vst.msk [vmem:[#allocation2 + $0x81] sm:$0xff] %vm627_vm4, %v586_v51  ;;  %v549_v1 = vadd.f32 %v2089_v57, %v2348_v17  ;;  %v497_v3 = vpop.f32.mrb[13].mxu0  ;;  %v2450_v4 = vld [vmem:[#allocation2 + $0x40] sm:$0x3]  ;;  %v847_v6 = vadd.f32 %v794_v60, %v706_v36  ;;  %v918_v8 = vrot.slane %v868_v54, 2  ;;  %v923_v12 = vrot.slane %v2432_v31, 2 }
 0x104   : > { %637 = vst.msk [vmem:[#allocation2 + $0x69] sm:$0xff] %vm627_vm4, %v584_v56  ;;  %v547_v13 = vadd.f32 %v2348_v17, %v497_v3  ;;  %v2090_v14 = vpop.f32.mrb[14].mxu0  ;;  %v2457_v21 = vmul.f32 %v2386_v62, %v2450_v4  ;;  %v917_v22 = vsel %vm914_vm7, %v915_v55, %v916_v0  ;;  %v1028_v23 = vmul.f32 %v2381_v58, %v2406_v15  ;;  %v2482_v52 = vld [vmem:[#allocation2 + $0x38] sm:$0xff]  ;;  %v2570_v31 = vld [vmem:[#allocation2 + $0x50] sm:$0xff] }
 0x105   : > { %v569_v24 = vmax.f32 %v549_v1, 0.0  ;;  %v550_v26 = vadd.f32 %v2090_v14, %v2348_v17  ;;  %v500_v27 = vpop.f32.mrb[15].mxu0  ;;  %v919_v28 = vsel %vm914_vm7, %v916_v0, %v918_v8  ;;  %v971_v29 = vadd.f32 %v917_v22, %v846_v61 }
 0x106   : > { %v567_v30 = vmax.f32 %v547_v13, 0.0  ;;  %v548_v33 = vadd.f32 %v2348_v17, %v500_v27  ;;  %v803_v35 = vrot.slane %v2457_v21, 1  ;;  %v972_v36 = vadd.f32 %v919_v28, %v847_v6 }
 0x107   : > { %v589_v37 = vmin.f32 %v569_v24, 6.0  ;;  %v570_v38 = vmax.f32 %v550_v26, 0.0  ;;  %v1007_v40 = vadd.f32 %v2397_v9, %v971_v29  ;;  %v1029_v41 = vmul.f32 %v2381_v58, %v2408_v16 }
 0x108   : > { %v587_v42 = vmin.f32 %v567_v30, 6.0  ;;  %v568_v43 = vmax.f32 %v548_v33, 0.0  ;;  %v1008_v44 = vadd.f32 %v992_v32, %v972_v36  ;;  %v1075_v5 = vrot.slane %v2400_v10, 1  ;;  %v2504_v30 = vld [vmem:[%s3091_s3 + $0x8] ss:$0 sm:$0xff] }
 0x109   : > { %642 = vst.msk [vmem:[#allocation2 + $0xa9] sm:$0xff] %vm627_vm4, %v589_v37  ;;  %v590_v46 = vmin.f32 %v570_v38, 6.0  ;;  %v1076_v47 = vrot.slane %v1028_v23, 1  ;;  %v1078_v49 = vrot.slane %v1029_v41, 1  ;;  %v1152_v50 = vmul.f32 %v2383_v59, %v2406_v15 }
 0x10a   : > { %640 = vst.msk [vmem:[#allocation2 + $0x91] sm:$0xff] %vm627_vm4, %v587_v42  ;;  %v588_v51 = vmin.f32 %v568_v43, 6.0  ;;  %v2093_v9 = vpop.f32.mrb[16].mxu0  ;;  %v1153_v54 = vmul.f32 %v2383_v59, %v2408_v16  ;;  %v1199_v32 = vrot.slane %v2403_v11, 2  ;;  %v1275_v10 = vmul.f32 %v2390_v2, %v2472_v39 }
 0x10b   : > { %643 = vst.msk [vmem:[#allocation2 + $0xb1] sm:$0xff] %vm627_vm4, %v590_v46  ;;  %v553_v55 = vadd.f32 %v2093_v9, %v2348_v17  ;;  %v513_v56 = vpop.f32.mrb[17].mxu0  ;;  %v1077_v57 = vsel %vm789_vm6, %v1075_v5, %v1076_v47  ;;  %v1079_v60 = vsel %vm789_vm6, %v1076_v47, %v1078_v49  ;;  %v1200_v61 = vrot.slane %v1152_v50, 2 }
 0x10c   : > { %641 = vst.msk [vmem:[#allocation2 + $0x99] sm:$0xff] %vm627_vm4, %v588_v51  ;;  %v551_v0 = vadd.f32 %v2348_v17, %v513_v56  ;;  %v2094_v16 = vpop.f32.mrb[18].mxu0  ;;  %v1131_v1 = vadd.f32 %v1077_v57, %v1007_v40  ;;  %v1132_v11 = vadd.f32 %v1079_v60, %v1008_v44  ;;  %v1202_v3 = vrot.slane %v1153_v54, 2 }
 0x10d   : > { %v573_v6 = vmax.f32 %v553_v55, 0.0  ;;  %v554_v8 = vadd.f32 %v2094_v16, %v2348_v17  ;;  %v516_v13 = vpop.f32.mrb[19].mxu0  ;;  %v1201_v14 = vsel %vm914_vm7, %v1199_v32, %v1200_v61  ;;  %v1276_v22 = vmul.f32 %v2390_v2, %v2482_v52 }
 0x10e   : > { %v571_v23 = vmax.f32 %v551_v0, 0.0  ;;  %v552_v24 = vadd.f32 %v2348_v17, %v516_v13  ;;  %v1203_v26 = vsel %vm914_vm7, %v1200_v61, %v1202_v3  ;;  %v1255_v27 = vadd.f32 %v1201_v14, %v1131_v1 }
 0x10f   : > { %v593_v28 = vmin.f32 %v573_v6, 6.0  ;;  %v574_v29 = vmax.f32 %v554_v8, 0.0  ;;  %v1256_v33 = vadd.f32 %v1203_v26, %v1132_v11  ;;  %v1311_v36 = vmul.f32 %v2393_v7, %v2472_v39  ;;  %v2540_v8 = vld [vmem:[%s3092_s4] ss:$0 sm:$0xff] }
 0x110   : > { %v591_v37 = vmin.f32 %v571_v23, 6.0  ;;  %v572_v38 = vmax.f32 %v552_v24, 0.0  ;;  %v1291_v40 = vadd.f32 %v1275_v10, %v1255_v27  ;;  %v1312_v17 = vmul.f32 %v2393_v7, %v2482_v52 }
 0x111   : > { %v625_v41 = vsel %vm2467_vm8, 0.0, %v593_v28  ;;  %v594_v42 = vmin.f32 %v574_v29, 6.0  ;;  %v1292_v43 = vadd.f32 %v1276_v22, %v1256_v33  ;;  %v1313_v44 = vmul.f32 %v2393_v7, %v2450_v4 }
 0x112   : > { %646 = vst.msk [vmem:[#allocation2 + $0xd9] sm:$0xff] %vm627_vm4, %v625_v41  ;;  %644 = vst.msk [vmem:[#allocation2 + $0xc1] sm:$0xff] %vm627_vm4, %v591_v37  ;;  %v592_v5 = vmin.f32 %v572_v38, 6.0  ;;  %v1359_v46 = vrot.slane %v1311_v36, 1  ;;  %v1360_v47 = vrot.slane %v1312_v17, 1  ;;  %v1435_v49 = vmul.f32 %v2504_v30, %v2472_v39 }
 0x113   : > { %v626_v50 = vsel %vm2467_vm8, 0.0, %v594_v42  ;;  %v1362_v51 = vrot.slane %v1313_v44, 1  ;;  %v1436_v9 = vmul.f32 %v2504_v30, %v2482_v52  ;;  %v1437_v54 = vmul.f32 %v2504_v30, %v2450_v4 }
 0x114   : > { %647 = vst.msk [vmem:[#allocation2 + $0xe1] sm:$0xff] %vm627_vm4, %v626_v50  ;;  %645 = vst.msk [vmem:[#allocation2 + $0xc9] sm:$0xff] %vm627_vm4, %v592_v5  ;;  %v1361_v32 = vsel %vm789_vm6, %v1359_v46, %v1360_v47  ;;  %v1483_v10 = vrot.slane %v1435_v49, 2  ;;  %v708_v55 = vmul.f32 %v2368_v48, %v2406_v15  ;;  %v745_v34 = vmul.f32 %v2386_v62, %v2406_v15  ;;  %v2568_v46 = vld [vmem:[#allocation2 + $0x48] sm:$0xff] }
 0x115   : > { %v1363_v56 = vsel %vm789_vm6, %v1360_v47, %v1362_v51  ;;  %v1415_v57 = vadd.f32 %v1361_v32, %v1291_v40  ;;  %v1484_v60 = vrot.slane %v1436_v9, 2  ;;  %v1486_v61 = vrot.slane %v1437_v54, 2  ;;  %v2572_v51 = vld [vmem:[#allocation2 + $0x58] sm:$0x3] }
 0x116   : > { %v1416_v0 = vadd.f32 %v1363_v56, %v1292_v43  ;;  %v795_v16 = vrot.slane %v2414_v19, 1  ;;  %v796_v1 = vrot.slane %v745_v34, 1  ;;  %v870_v11 = vmul.f32 %v2388_v63, %v2406_v15 }
 0x117   : > { %v1485_v3 = vsel %vm914_vm7, %v1483_v10, %v1484_v60  ;;  %v1487_v6 = vsel %vm914_vm7, %v1484_v60, %v1486_v61  ;;  %v920_v13 = vrot.slane %v2417_v20, 2  ;;  %v993_v14 = vmul.f32 %v2377_v53, %v2472_v39 }
 0x118   : > { %v1539_v22 = vadd.f32 %v1485_v3, %v1415_v57  ;;  %v1540_v19 = vadd.f32 %v1487_v6, %v1416_v0  ;;  %v797_v23 = vsel %vm789_vm6, %v795_v16, %v796_v1  ;;  %v799_v15 = vsel %vm789_vm6, %v796_v1, %v798_v45 }
 0x119   : > { %v848_v24 = vadd.f32 %v797_v23, %v2411_v18  ;;  %v849_v26 = vadd.f32 %v799_v15, %v708_v55  ;;  %v921_v27 = vrot.slane %v870_v11, 2  ;;  %v994_v28 = vmul.f32 %v2377_v53, %v2482_v52 }
 0x11a   : > { %v1562_v20 = vadd.f32 %v2540_v8, %v1539_v22  ;;  %v1563_v29 = vadd.f32 %v2540_v8, %v1540_v19  ;;  %v1030_v33 = vmul.f32 %v2381_v58, %v2472_v39  ;;  %v1031_v36 = vmul.f32 %v2381_v58, %v2482_v52 }
 0x11b   : > { %v922_v25 = vsel %vm914_vm7, %v920_v13, %v921_v27  ;;  %v924_v18 = vsel %vm914_vm7, %v921_v27, %v923_v12  ;;  %v1032_v45 = vmul.f32 %v2381_v58, %v2450_v4  ;;  %v1154_v37 = vmul.f32 %v2383_v59, %v2472_v39 }
 0x11c   : > { %v1578_v38 = vmax.f32 %v1562_v20, 0.0  ;;  %v1579_v40 = vmax.f32 %v1563_v29, 0.0  ;;  %v973_v17 = vadd.f32 %v922_v25, %v848_v24  ;;  %v974_v41 = vadd.f32 %v924_v18, %v849_v26 }
 0x11d   : > { %v1080_v42 = vrot.slane %v1030_v33, 1  ;;  %v1081_v43 = vrot.slane %v1031_v36, 1  ;;  %v1083_v44 = vrot.slane %v1032_v45, 1  ;;  %v1155_v5 = vmul.f32 %v2383_v59, %v2482_v52 }
 0x11e   : > { %v1594_v12 = vmin.f32 %v1578_v38, 6.0  ;;  %v1595_v47 = vmin.f32 %v1579_v40, 6.0  ;;  %v1009_v49 = vadd.f32 %v993_v14, %v973_v17  ;;  %v1010_v50 = vadd.f32 %v994_v28, %v974_v41 }
 0x11f   : > { %v1082_v9 = vsel %vm789_vm6, %v1080_v42, %v1081_v43  ;;  %v1084_v54 = vsel %vm789_vm6, %v1081_v43, %v1083_v44  ;;  %v1156_v32 = vmul.f32 %v2383_v59, %v2450_v4  ;;  %v1204_v10 = vrot.slane %v1154_v37, 2 }
 0x120   : > { %v1610_v55 = vpack.c.bf16 %v1595_v47, %v1594_v12  ;;  %v1133_v34 = vadd.f32 %v1082_v9, %v1009_v49  ;;  %v1134_v56 = vadd.f32 %v1084_v54, %v1010_v50  ;;  %v1205_v57 = vrot.slane %v1155_v5, 2 }
 0x121   : > { %v1207_v60 = vrot.slane %v1156_v32, 2  ;;  %v1277_v61 = vmul.f32 %v2390_v2, %v2568_v46  ;;  %v1278_v0 = vmul.f32 %v2390_v2, %v2570_v31  ;;  %v1314_v16 = vmul.f32 %v2393_v7, %v2568_v46 }
 0x122   : > { %2099 = vmatprep.mubr.msk.bf16.mxu1 %vm627_vm4, %v1610_v55  ;;  %v1206_v1 = vsel %vm914_vm7, %v1204_v10, %v1205_v57  ;;  %v1315_v11 = vmul.f32 %v2393_v7, %v2570_v31  ;;  %v1316_v3 = vmul.f32 %v2393_v7, %v2572_v51  ;;  %v1438_v6 = vmul.f32 %v2504_v30, %v2568_v46 }
 0x123   : > { %v1208_v13 = vsel %vm914_vm7, %v1205_v57, %v1207_v60  ;;  %v1257_v14 = vadd.f32 %v1206_v1, %v1133_v34  ;;  %v1364_v22 = vrot.slane %v1314_v16, 1  ;;  %v1439_v19 = vmul.f32 %v2504_v30, %v2570_v31 }
 0x124   : > { %v1258_v23 = vadd.f32 %v1208_v13, %v1134_v56  ;;  %v1365_v15 = vrot.slane %v1315_v11, 1  ;;  %v1367_v24 = vrot.slane %v1316_v3, 1  ;;  %v1440_v26 = vmul.f32 %v2504_v30, %v2572_v51 }
 0x125   : > { %v1293_v27 = vadd.f32 %v1277_v61, %v1257_v14  ;;  %v1488_v28 = vrot.slane %v1438_v6, 2  ;;  %v1489_v20 = vrot.slane %v1439_v19, 2  ;;  %v709_v29 = vmul.f32 %v2368_v48, %v2472_v39 }
 0x126   : > { %v1294_v33 = vadd.f32 %v1278_v0, %v1258_v23  ;;  %v1366_v36 = vsel %vm789_vm6, %v1364_v22, %v1365_v15  ;;  %v1368_v25 = vsel %vm789_vm6, %v1365_v15, %v1367_v24  ;;  %v1491_v18 = vrot.slane %v1440_v26, 2  ;;  %v2635_v15 = vld [vmem:[#allocation2 + $0x60] sm:$0xff]  ;;  %v2637_v24 = vld [vmem:[#allocation2 + $0x68] sm:$0xff] }
 0x127   : > { %v1417_v45 = vadd.f32 %v1366_v36, %v1293_v27  ;;  %v1490_v37 = vsel %vm914_vm7, %v1488_v28, %v1489_v20  ;;  %v710_v38 = vmul.f32 %v2368_v48, %v2482_v52  ;;  %v747_v40 = vmul.f32 %v2386_v62, %v2472_v39 }
 0x128   : > { %v1418_v17 = vadd.f32 %v1368_v25, %v1294_v33  ;;  %v1492_v41 = vsel %vm914_vm7, %v1489_v20, %v1491_v18  ;;  %v748_v42 = vmul.f32 %v2386_v62, %v2482_v52  ;;  %v872_v43 = vmul.f32 %v2388_v63, %v2472_v39  ;;  %v2643_v33 = vld [vmem:[#allocation2 + $0x70] sm:$0x3] }
 0x129   : > { %v1541_v44 = vadd.f32 %v1490_v37, %v1417_v45  ;;  %v800_v5 = vrot.slane %v747_v40, 1  ;;  %v873_v12 = vmul.f32 %v2388_v63, %v2482_v52  ;;  %v874_v47 = vmul.f32 %v2388_v63, %v2450_v4 }
 0x12a   : > { %v1542_v49 = vadd.f32 %v1492_v41, %v1418_v17  ;;  %v801_v50 = vrot.slane %v748_v42, 1  ;;  %v925_v9 = vrot.slane %v872_v43, 2  ;;  %v995_v54 = vmul.f32 %v2377_v53, %v2568_v46 }
 0x12b   : > { %v1564_v32 = vadd.f32 %v2540_v8, %v1541_v44  ;;  %v926_v10 = vrot.slane %v873_v12, 2  ;;  %v928_v55 = vrot.slane %v874_v47, 2  ;;  %v996_v39 = vmul.f32 %v2377_v53, %v2570_v31 }
 0x12c   : > { %v1565_v34 = vadd.f32 %v2540_v8, %v1542_v49  ;;  %v802_v52 = vsel %vm789_vm6, %v800_v5, %v801_v50  ;;  %v804_v4 = vsel %vm789_vm6, %v801_v50, %v803_v35  ;;  %v1033_v56 = vmul.f32 %v2381_v58, %v2568_v46 }
 0x12d   : > { %v1580_v57 = vmax.f32 %v1564_v32, 0.0  ;;  %v850_v60 = vadd.f32 %v802_v52, %v709_v29  ;;  %v851_v61 = vadd.f32 %v804_v4, %v710_v38  ;;  %v927_v0 = vsel %vm914_vm7, %v925_v9, %v926_v10 }
 0x12e   : > { %v1581_v16 = vmax.f32 %v1565_v34, 0.0  ;;  %v929_v1 = vsel %vm914_vm7, %v926_v10, %v928_v55  ;;  %v1034_v11 = vmul.f32 %v2381_v58, %v2570_v31  ;;  %v1035_v3 = vmul.f32 %v2381_v58, %v2572_v51 }
 0x12f   : > { %v1596_v21 = vmin.f32 %v1580_v57, 6.0  ;;  %v975_v6 = vadd.f32 %v927_v0, %v850_v60  ;;  %v976_v35 = vadd.f32 %v929_v1, %v851_v61  ;;  %v1085_v13 = vrot.slane %v1033_v56, 1 }
 0x130   : > { %v1597_v14 = vmin.f32 %v1581_v16, 6.0  ;;  %v1086_v22 = vrot.slane %v1034_v11, 1  ;;  %v1088_v19 = vrot.slane %v1035_v3, 1  ;;  %v1157_v23 = vmul.f32 %v2383_v59, %v2568_v46 }
 0x131   : > { %v1011_v26 = vadd.f32 %v995_v54, %v975_v6  ;;  %v1012_v27 = vadd.f32 %v996_v39, %v976_v35  ;;  %v1158_v28 = vmul.f32 %v2383_v59, %v2570_v31  ;;  %v1159_v20 = vmul.f32 %v2383_v59, %v2572_v51 }
 0x132   : > { %v1611_v29 = vpack.c.bf16 %v1597_v14, %v1596_v21  ;;  %v1087_v36 = vsel %vm789_vm6, %v1085_v13, %v1086_v22  ;;  %v1089_v25 = vsel %vm789_vm6, %v1086_v22, %v1088_v19  ;;  %v1209_v18 = vrot.slane %v1157_v23, 2 }
 0x133   : > { %v1135_v45 = vadd.f32 %v1087_v36, %v1011_v26  ;;  %v1136_v37 = vadd.f32 %v1089_v25, %v1012_v27  ;;  %v1210_v38 = vrot.slane %v1158_v28, 2  ;;  %v1212_v40 = vrot.slane %v1159_v20, 2 }
 0x134   : > { %2100 = vmatmul.mubr.msk.bf16.vlgmr.msra.gmra.mrb[0].mxu1 %vm627_vm4, %v1611_v29  ;;  %v1279_v17 = vmul.f32 %v2390_v2, %v2635_v15  ;;  %v1280_v41 = vmul.f32 %v2390_v2, %v2637_v24  ;;  %v1317_v42 = vmul.f32 %v2393_v7, %v2635_v15  ;;  %v1318_v43 = vmul.f32 %v2393_v7, %v2637_v24 }
 0x135   : > { %v1211_v44 = vsel %vm914_vm7, %v1209_v18, %v1210_v38  ;;  %v1213_v5 = vsel %vm914_vm7, %v1210_v38, %v1212_v40  ;;  %v1319_v12 = vmul.f32 %v2393_v7, %v2643_v33  ;;  %v1441_v47 = vmul.f32 %v2504_v30, %v2635_v15 }
 0x136   : > { %v1259_v49 = vadd.f32 %v1211_v44, %v1135_v45  ;;  %v1260_v50 = vadd.f32 %v1213_v5, %v1136_v37  ;;  %v1369_v9 = vrot.slane %v1317_v42, 1  ;;  %v1370_v54 = vrot.slane %v1318_v43, 1 }
 0x137   : > { %v1372_v32 = vrot.slane %v1319_v12, 1  ;;  %v1442_v10 = vmul.f32 %v2504_v30, %v2637_v24  ;;  %v1443_v55 = vmul.f32 %v2504_v30, %v2643_v33  ;;  %v1493_v39 = vrot.slane %v1441_v47, 2 }
 0x138   : > { %v1295_v34 = vadd.f32 %v1279_v17, %v1259_v49  ;;  %v1296_v52 = vadd.f32 %v1280_v41, %v1260_v50  ;;  %v1371_v4 = vsel %vm789_vm6, %v1369_v9, %v1370_v54  ;;  %v711_v56 = vmul.f32 %v2368_v48, %v2568_v46  ;;  %v2700_v50 = vld [vmem:[#allocation2 + $0x78] sm:$0xff]  ;;  %v2702_v9 = vld [vmem:[#allocation2 + $0x80] sm:$0xff] }
 0x139   : > { %v1373_v57 = vsel %vm789_vm6, %v1370_v54, %v1372_v32  ;;  %v1494_v60 = vrot.slane %v1442_v10, 2  ;;  %v1496_v61 = vrot.slane %v1443_v55, 2  ;;  %v712_v0 = vmul.f32 %v2368_v48, %v2570_v31 }
 0x13a   : > { %v1419_v16 = vadd.f32 %v1371_v4, %v1295_v34  ;;  %v1420_v1 = vadd.f32 %v1373_v57, %v1296_v52  ;;  %v750_v11 = vmul.f32 %v2386_v62, %v2568_v46  ;;  %v751_v3 = vmul.f32 %v2386_v62, %v2570_v31 }
 0x13b   : > { %v1495_v21 = vsel %vm914_vm7, %v1493_v39, %v1494_v60  ;;  %v1497_v6 = vsel %vm914_vm7, %v1494_v60, %v1496_v61  ;;  %v752_v35 = vmul.f32 %v2386_v62, %v2572_v51  ;;  %v875_v13 = vmul.f32 %v2388_v63, %v2568_v46 }
 0x13c   : > { %v1543_v14 = vadd.f32 %v1495_v21, %v1419_v16  ;;  %v1544_v22 = vadd.f32 %v1497_v6, %v1420_v1  ;;  %v805_v19 = vrot.slane %v750_v11, 1  ;;  %v806_v23 = vrot.slane %v751_v3, 1 }
 0x13d   : > { %v808_v26 = vrot.slane %v752_v35, 1  ;;  %v876_v27 = vmul.f32 %v2388_v63, %v2570_v31  ;;  %v877_v28 = vmul.f32 %v2388_v63, %v2572_v51  ;;  %v930_v20 = vrot.slane %v875_v13, 2 }
 0x13e   : > { %v1566_v29 = vadd.f32 %v2540_v8, %v1543_v14  ;;  %v1567_v36 = vadd.f32 %v2540_v8, %v1544_v22  ;;  %v807_v25 = vsel %vm789_vm6, %v805_v19, %v806_v23  ;;  %v997_v46 = vmul.f32 %v2377_v53, %v2635_v15 }
 0x13f   : > { %v809_v18 = vsel %vm789_vm6, %v806_v23, %v808_v26  ;;  %v852_v45 = vadd.f32 %v807_v25, %v711_v56  ;;  %v931_v37 = vrot.slane %v876_v27, 2  ;;  %v933_v38 = vrot.slane %v877_v28, 2  ;;  %v2710_v56 = vld [vmem:[#allocation2 + $0x88] sm:$0x3] }
 0x140   : > { %v1582_v40 = vmax.f32 %v1566_v29, 0.0  ;;  %v1583_v31 = vmax.f32 %v1567_v36, 0.0  ;;  %v853_v17 = vadd.f32 %v809_v18, %v712_v0  ;;  %v998_v51 = vmul.f32 %v2377_v53, %v2637_v24 }
 0x141   : > { %v932_v41 = vsel %vm914_vm7, %v930_v20, %v931_v37  ;;  %v934_v42 = vsel %vm914_vm7, %v931_v37, %v933_v38  ;;  %v1036_v43 = vmul.f32 %v2381_v58, %v2635_v15  ;;  %v1037_v44 = vmul.f32 %v2381_v58, %v2637_v24 }
 0x142   : > { %v1598_v5 = vmin.f32 %v1582_v40, 6.0  ;;  %v1599_v12 = vmin.f32 %v1583_v31, 6.0  ;;  %v977_v47 = vadd.f32 %v932_v41, %v852_v45  ;;  %v978_v49 = vadd.f32 %v934_v42, %v853_v17 }
 0x143   : > { %v1038_v54 = vmul.f32 %v2381_v58, %v2643_v33  ;;  %v1090_v32 = vrot.slane %v1036_v43, 1  ;;  %v1091_v10 = vrot.slane %v1037_v44, 1  ;;  %v1160_v55 = vmul.f32 %v2383_v59, %v2635_v15 }
 0x144   : > { %v1612_v39 = vpack.c.bf16 %v1599_v12, %v1598_v5  ;;  %v1013_v34 = vadd.f32 %v997_v46, %v977_v47  ;;  %v1014_v52 = vadd.f32 %v998_v51, %v978_v49  ;;  %v1161_v4 = vmul.f32 %v2383_v59, %v2637_v24 }
 0x145   : > { %v1092_v57 = vsel %vm789_vm6, %v1090_v32, %v1091_v10  ;;  %v1093_v60 = vrot.slane %v1038_v54, 1  ;;  %v1162_v61 = vmul.f32 %v2383_v59, %v2643_v33  ;;  %v1214_v0 = vrot.slane %v1160_v55, 2 }
 0x146   : > { %2103 = vmatprep.mubr.msk.bf16.mxu1 %vm627_vm4, %v1612_v39  ;;  %v1137_v16 = vadd.f32 %v1092_v57, %v1013_v34  ;;  %v1215_v1 = vrot.slane %v1161_v4, 2  ;;  %v1281_v11 = vmul.f32 %v2390_v2, %v2700_v50  ;;  %v1282_v3 = vmul.f32 %v2390_v2, %v2702_v9 }
 0x147   : > { %v1094_v21 = vsel %vm789_vm6, %v1091_v10, %v1093_v60  ;;  %v1217_v6 = vrot.slane %v1162_v61, 2  ;;  %v1320_v35 = vmul.f32 %v2393_v7, %v2700_v50  ;;  %v1321_v13 = vmul.f32 %v2393_v7, %v2702_v9 }
 0x148   : > { %v1138_v14 = vadd.f32 %v1094_v21, %v1014_v52  ;;  %v1216_v22 = vsel %vm914_vm7, %v1214_v0, %v1215_v1  ;;  %v1322_v19 = vmul.f32 %v2393_v7, %v2710_v56  ;;  %v1444_v23 = vmul.f32 %v2504_v30, %v2700_v50 }
 0x149   : > { %v1218_v26 = vsel %vm914_vm7, %v1215_v1, %v1217_v6  ;;  %v1261_v27 = vadd.f32 %v1216_v22, %v1137_v16  ;;  %v1374_v28 = vrot.slane %v1320_v35, 1  ;;  %v1375_v20 = vrot.slane %v1321_v13, 1 }
 0x14a   : > { %v1262_v29 = vadd.f32 %v1218_v26, %v1138_v14  ;;  %v1377_v36 = vrot.slane %v1322_v19, 1  ;;  %v1445_v25 = vmul.f32 %v2504_v30, %v2702_v9  ;;  %v1446_v46 = vmul.f32 %v2504_v30, %v2710_v56 }
 0x14b   : > { %v1297_v18 = vadd.f32 %v1281_v11, %v1261_v27  ;;  %v1376_v45 = vsel %vm789_vm6, %v1374_v28, %v1375_v20  ;;  %v1498_v37 = vrot.slane %v1444_v23, 2  ;;  %v713_v38 = vmul.f32 %v2368_v48, %v2635_v15 }
 0x14c   : > { %v1298_v40 = vadd.f32 %v1282_v3, %v1262_v29  ;;  %v1378_v31 = vsel %vm789_vm6, %v1375_v20, %v1377_v36  ;;  %v1499_v17 = vrot.slane %v1445_v25, 2  ;;  %v1501_v51 = vrot.slane %v1446_v46, 2  ;;  %v2771_v36 = vld [vmem:[#allocation2 + $0x90] sm:$0xff]  ;;  %v2773_v25 = vld [vmem:[#allocation2 + $0x98] sm:$0xff] }
 0x14d   : > { %v1421_v41 = vadd.f32 %v1376_v45, %v1297_v18  ;;  %v714_v42 = vmul.f32 %v2368_v48, %v2637_v24  ;;  %v753_v43 = vmul.f32 %v2386_v62, %v2635_v15  ;;  %v754_v44 = vmul.f32 %v2386_v62, %v2637_v24 }
 0x14e   : > { %v1422_v5 = vadd.f32 %v1378_v31, %v1298_v40  ;;  %v1500_v12 = vsel %vm914_vm7, %v1498_v37, %v1499_v17  ;;  %v1502_v47 = vsel %vm914_vm7, %v1499_v17, %v1501_v51  ;;  %v755_v49 = vmul.f32 %v2386_v62, %v2643_v33  ;;  %v2779_v40 = vld [vmem:[#allocation2 + $0xa0] sm:$0x3] }
 0x14f   : > { %v1545_v54 = vadd.f32 %v1500_v12, %v1421_v41  ;;  %v810_v32 = vrot.slane %v753_v43, 1  ;;  %v811_v10 = vrot.slane %v754_v44, 1  ;;  %v878_v55 = vmul.f32 %v2388_v63, %v2635_v15 }
 0x150   : > { %v1546_v39 = vadd.f32 %v1502_v47, %v1422_v5  ;;  %v813_v34 = vrot.slane %v755_v49, 1  ;;  %v879_v52 = vmul.f32 %v2388_v63, %v2637_v24  ;;  %v880_v4 = vmul.f32 %v2388_v63, %v2643_v33 }
 0x151   : > { %v1568_v57 = vadd.f32 %v2540_v8, %v1545_v54  ;;  %v812_v60 = vsel %vm789_vm6, %v810_v32, %v811_v10  ;;  %v935_v61 = vrot.slane %v878_v55, 2  ;;  %v999_v0 = vmul.f32 %v2377_v53, %v2700_v50 }
 0x152   : > { %v1569_v16 = vadd.f32 %v2540_v8, %v1546_v39  ;;  %v814_v15 = vsel %vm789_vm6, %v811_v10, %v813_v34  ;;  %v854_v1 = vadd.f32 %v812_v60, %v713_v38  ;;  %v936_v11 = vrot.slane %v879_v52, 2 }
 0x153   : > { %v1584_v3 = vmax.f32 %v1568_v57, 0.0  ;;  %v855_v21 = vadd.f32 %v814_v15, %v714_v42  ;;  %v938_v24 = vrot.slane %v880_v4, 2  ;;  %v1000_v33 = vmul.f32 %v2377_v53, %v2702_v9 }
 0x154   : > { %v1585_v6 = vmax.f32 %v1569_v16, 0.0  ;;  %v937_v35 = vsel %vm914_vm7, %v935_v61, %v936_v11  ;;  %v1039_v13 = vmul.f32 %v2381_v58, %v2700_v50  ;;  %v1040_v14 = vmul.f32 %v2381_v58, %v2702_v9 }
 0x155   : > { %v1600_v22 = vmin.f32 %v1584_v3, 6.0  ;;  %v939_v19 = vsel %vm914_vm7, %v936_v11, %v938_v24  ;;  %v979_v23 = vadd.f32 %v937_v35, %v854_v1  ;;  %v1041_v26 = vmul.f32 %v2381_v58, %v2710_v56 }
 0x156   : > { %v1601_v27 = vmin.f32 %v1585_v6, 6.0  ;;  %v980_v28 = vadd.f32 %v939_v19, %v855_v21  ;;  %v1095_v20 = vrot.slane %v1039_v13, 1  ;;  %v1096_v29 = vrot.slane %v1040_v14, 1 }
 0x157   : > { %v1015_v46 = vadd.f32 %v999_v0, %v979_v23  ;;  %v1098_v18 = vrot.slane %v1041_v26, 1  ;;  %v1163_v45 = vmul.f32 %v2383_v59, %v2700_v50  ;;  %v1164_v37 = vmul.f32 %v2383_v59, %v2702_v9 }
 0x158   : > { %v1613_v38 = vpack.c.bf16 %v1601_v27, %v1600_v22  ;;  %v1016_v31 = vadd.f32 %v1000_v33, %v980_v28  ;;  %v1097_v17 = vsel %vm789_vm6, %v1095_v20, %v1096_v29  ;;  %v1165_v51 = vmul.f32 %v2383_v59, %v2710_v56 }
 0x159   : > { %v1099_v41 = vsel %vm789_vm6, %v1096_v29, %v1098_v18  ;;  %v1139_v42 = vadd.f32 %v1097_v17, %v1015_v46  ;;  %v1219_v43 = vrot.slane %v1163_v45, 2  ;;  %v1220_v44 = vrot.slane %v1164_v37, 2 }
 0x15a   : > { %2104 = vmatmul.mubr.msk.bf16.gmra.mrb[4].mxu1 %vm627_vm4, %v1613_v38  ;;  %v1140_v5 = vadd.f32 %v1099_v41, %v1016_v31  ;;  %v1222_v12 = vrot.slane %v1165_v51, 2  ;;  %v1283_v47 = vmul.f32 %v2390_v2, %v2771_v36  ;;  %v1284_v49 = vmul.f32 %v2390_v2, %v2773_v25 }
 0x15b   : > { %v1221_v54 = vsel %vm914_vm7, %v1219_v43, %v1220_v44  ;;  %v1323_v32 = vmul.f32 %v2393_v7, %v2771_v36  ;;  %v1324_v10 = vmul.f32 %v2393_v7, %v2773_v25  ;;  %v1325_v55 = vmul.f32 %v2393_v7, %v2779_v40 }
 0x15c   : > { %v1223_v39 = vsel %vm914_vm7, %v1220_v44, %v1222_v12  ;;  %v1263_v34 = vadd.f32 %v1221_v54, %v1139_v42  ;;  %v1447_v52 = vmul.f32 %v2504_v30, %v2771_v36  ;;  %v1448_v4 = vmul.f32 %v2504_v30, %v2773_v25 }
 0x15d   : > { %v1264_v57 = vadd.f32 %v1223_v39, %v1140_v5  ;;  %v1379_v60 = vrot.slane %v1323_v32, 1  ;;  %v1380_v61 = vrot.slane %v1324_v10, 1  ;;  %v1382_v0 = vrot.slane %v1325_v55, 1 }
 0x15e   : > { %v1299_v16 = vadd.f32 %v1283_v47, %v1263_v34  ;;  %v1449_v15 = vmul.f32 %v2504_v30, %v2779_v40  ;;  %v1503_v1 = vrot.slane %v1447_v52, 2  ;;  %v1504_v11 = vrot.slane %v1448_v4, 2  ;;  %v2839_v34 = vld [vmem:[#allocation2 + $0xa8] sm:$0xff] }
 0x15f   : > { %v1300_v3 = vadd.f32 %v1284_v49, %v1264_v57  ;;  %v1381_v21 = vsel %vm789_vm6, %v1379_v60, %v1380_v61  ;;  %v1383_v24 = vsel %vm789_vm6, %v1380_v61, %v1382_v0  ;;  %v715_v33 = vmul.f32 %v2368_v48, %v2700_v50  ;;  %v2844_v61 = vld [vmem:[#allocation2 + $0xb0] sm:$0xff] }
 0x160   : > { %v1423_v6 = vadd.f32 %v1381_v21, %v1299_v16  ;;  %v1505_v35 = vsel %vm914_vm7, %v1503_v1, %v1504_v11  ;;  %v1506_v13 = vrot.slane %v1449_v15, 2  ;;  %v716_v14 = vmul.f32 %v2368_v48, %v2702_v9 }
 0x161   : > { %v1424_v22 = vadd.f32 %v1383_v24, %v1300_v3  ;;  %v756_v19 = vmul.f32 %v2386_v62, %v2700_v50  ;;  %v757_v23 = vmul.f32 %v2386_v62, %v2702_v9  ;;  %v758_v26 = vmul.f32 %v2386_v62, %v2710_v56  ;;  %v2846_v3 = vld [vmem:[#allocation2 + $0xb8] sm:$0x3] }
 0x162   : > { %v1507_v27 = vsel %vm914_vm7, %v1504_v11, %v1506_v13  ;;  %v1547_v28 = vadd.f32 %v1505_v35, %v1423_v6  ;;  %v881_v20 = vmul.f32 %v2388_v63, %v2700_v50  ;;  %v882_v29 = vmul.f32 %v2388_v63, %v2702_v9 }
 0x163   : > { %v1548_v46 = vadd.f32 %v1507_v27, %v1424_v22  ;;  %v815_v18 = vrot.slane %v756_v19, 1  ;;  %v816_v45 = vrot.slane %v757_v23, 1  ;;  %v818_v37 = vrot.slane %v758_v26, 1 }
 0x164   : > { %v1570_v38 = vadd.f32 %v2540_v8, %v1547_v28  ;;  %v883_v31 = vmul.f32 %v2388_v63, %v2710_v56  ;;  %v940_v17 = vrot.slane %v881_v20, 2  ;;  %v941_v51 = vrot.slane %v882_v29, 2 }
 0x165   : > { %v1571_v41 = vadd.f32 %v2540_v8, %v1548_v46  ;;  %v817_v42 = vsel %vm789_vm6, %v815_v18, %v816_v45  ;;  %v819_v50 = vsel %vm789_vm6, %v816_v45, %v818_v37  ;;  %v1001_v9 = vmul.f32 %v2377_v53, %v2771_v36 }
 0x166   : > { %v1586_v43 = vmax.f32 %v1570_v38, 0.0  ;;  %v856_v44 = vadd.f32 %v817_v42, %v715_v33  ;;  %v857_v5 = vadd.f32 %v819_v50, %v716_v14  ;;  %v942_v12 = vsel %vm914_vm7, %v940_v17, %v941_v51 }
 0x167   : > { %v1587_v47 = vmax.f32 %v1571_v41, 0.0  ;;  %v943_v49 = vrot.slane %v883_v31, 2  ;;  %v1002_v56 = vmul.f32 %v2377_v53, %v2773_v25  ;;  %v1042_v54 = vmul.f32 %v2381_v58, %v2771_v36 }
 0x168   : > { %v1602_v32 = vmin.f32 %v1586_v43, 6.0  ;;  %v981_v10 = vadd.f32 %v942_v12, %v856_v44  ;;  %v1043_v55 = vmul.f32 %v2381_v58, %v2773_v25  ;;  %v1044_v39 = vmul.f32 %v2381_v58, %v2779_v40 }
 0x169   : > { %v1603_v52 = vmin.f32 %v1587_v47, 6.0  ;;  %v944_v4 = vsel %vm914_vm7, %v941_v51, %v943_v49  ;;  %v1100_v57 = vrot.slane %v1042_v54, 1  ;;  %v1166_v60 = vmul.f32 %v2383_v59, %v2771_v36 }
 0x16a   : > { %v982_v0 = vadd.f32 %v944_v4, %v857_v5  ;;  %v1017_v16 = vadd.f32 %v1001_v9, %v981_v10  ;;  %v1101_v15 = vrot.slane %v1043_v55, 1  ;;  %v1103_v1 = vrot.slane %v1044_v39, 1 }
 0x16b   : > { %v1614_v11 = vpack.c.bf16 %v1603_v52, %v1602_v32  ;;  %v1167_v21 = vmul.f32 %v2383_v59, %v2773_v25  ;;  %v1168_v24 = vmul.f32 %v2383_v59, %v2779_v40  ;;  %v1224_v33 = vrot.slane %v1166_v60, 2 }
 0x16c   : > { %v1018_v6 = vadd.f32 %v1002_v56, %v982_v0  ;;  %v1102_v35 = vsel %vm789_vm6, %v1100_v57, %v1101_v15  ;;  %v1104_v13 = vsel %vm789_vm6, %v1101_v15, %v1103_v1  ;;  %v1285_v14 = vmul.f32 %v2390_v2, %v2839_v34 }
 0x16d   : > { %2107 = vmatprep.mubr.msk.bf16.mxu1 %vm627_vm4, %v1614_v11  ;;  %v1141_v22 = vadd.f32 %v1102_v35, %v1017_v16  ;;  %v1225_v19 = vrot.slane %v1167_v21, 2  ;;  %v1227_v23 = vrot.slane %v1168_v24, 2  ;;  %v1286_v26 = vmul.f32 %v2390_v2, %v2844_v61 }
 0x16e   : > { %v1142_v27 = vadd.f32 %v1104_v13, %v1018_v6  ;;  %v1326_v28 = vmul.f32 %v2393_v7, %v2839_v34  ;;  %v1327_v20 = vmul.f32 %v2393_v7, %v2844_v61  ;;  %v1328_v29 = vmul.f32 %v2393_v7, %v2846_v3 }
 0x16f   : > { %v1226_v46 = vsel %vm914_vm7, %v1224_v33, %v1225_v19  ;;  %v1228_v18 = vsel %vm914_vm7, %v1225_v19, %v1227_v23  ;;  %v1450_v45 = vmul.f32 %v2504_v30, %v2839_v34  ;;  %v1451_v37 = vmul.f32 %v2504_v30, %v2844_v61 }
 0x170   : > { %v1265_v38 = vadd.f32 %v1226_v46, %v1141_v22  ;;  %v1266_v31 = vadd.f32 %v1228_v18, %v1142_v27  ;;  %v1384_v17 = vrot.slane %v1326_v28, 1  ;;  %v1385_v51 = vrot.slane %v1327_v20, 1 }
 0x171   : > { %v1387_v41 = vrot.slane %v1328_v29, 1  ;;  %v1452_v42 = vmul.f32 %v2504_v30, %v2846_v3  ;;  %v1508_v50 = vrot.slane %v1450_v45, 2  ;;  %v1509_v9 = vrot.slane %v1451_v37, 2  ;;  %v2907_v37 = vld [vmem:[#allocation2 + $0xc0] sm:$0xff] }
 0x172   : > { %v1301_v43 = vadd.f32 %v1285_v14, %v1265_v38  ;;  %v1302_v44 = vadd.f32 %v1286_v26, %v1266_v31  ;;  %v1386_v5 = vsel %vm789_vm6, %v1384_v17, %v1385_v51  ;;  %v717_v12 = vmul.f32 %v2368_v48, %v2771_v36  ;;  %v2911_v17 = vld [vmem:[#allocation2 + $0xc8] sm:$0xff] }
 0x173   : > { %v1388_v47 = vsel %vm789_vm6, %v1385_v51, %v1387_v41  ;;  %v1510_v49 = vsel %vm914_vm7, %v1508_v50, %v1509_v9  ;;  %v1511_v56 = vrot.slane %v1452_v42, 2  ;;  %v718_v54 = vmul.f32 %v2368_v48, %v2773_v25 }
 0x174   : > { %v1425_v32 = vadd.f32 %v1386_v5, %v1301_v43  ;;  %v1426_v10 = vadd.f32 %v1388_v47, %v1302_v44  ;;  %v759_v55 = vmul.f32 %v2386_v62, %v2771_v36  ;;  %v760_v39 = vmul.f32 %v2386_v62, %v2773_v25 }
 0x175   : > { %v1512_v52 = vsel %vm914_vm7, %v1509_v9, %v1511_v56  ;;  %v761_v4 = vmul.f32 %v2386_v62, %v2779_v40  ;;  %v884_v57 = vmul.f32 %v2388_v63, %v2771_v36  ;;  %v885_v60 = vmul.f32 %v2388_v63, %v2773_v25 }
 0x176   : > { %v1549_v0 = vadd.f32 %v1510_v49, %v1425_v32  ;;  %v1550_v16 = vadd.f32 %v1512_v52, %v1426_v10  ;;  %v820_v15 = vrot.slane %v759_v55, 1  ;;  %v821_v1 = vrot.slane %v760_v39, 1 }
 0x177   : > { %v823_v11 = vrot.slane %v761_v4, 1  ;;  %v886_v21 = vmul.f32 %v2388_v63, %v2779_v40  ;;  %v945_v24 = vrot.slane %v884_v57, 2  ;;  %v946_v33 = vrot.slane %v885_v60, 2 }
 0x178   : > { %v1572_v6 = vadd.f32 %v2540_v8, %v1549_v0  ;;  %v1573_v35 = vadd.f32 %v2540_v8, %v1550_v16  ;;  %v822_v13 = vsel %vm789_vm6, %v820_v15, %v821_v1  ;;  %v1003_v36 = vmul.f32 %v2377_v53, %v2839_v34 }
 0x179   : > { %v824_v25 = vsel %vm789_vm6, %v821_v1, %v823_v11  ;;  %v858_v14 = vadd.f32 %v822_v13, %v717_v12  ;;  %v947_v22 = vsel %vm914_vm7, %v945_v24, %v946_v33  ;;  %v948_v19 = vrot.slane %v886_v21, 2  ;;  %v2917_v12 = vld [vmem:[#allocation2 + $0xd0] sm:$0x3] }
 0x17a   : > { %v1588_v23 = vmax.f32 %v1572_v6, 0.0  ;;  %v1589_v26 = vmax.f32 %v1573_v35, 0.0  ;;  %v859_v40 = vadd.f32 %v824_v25, %v718_v54  ;;  %v1004_v27 = vmul.f32 %v2377_v53, %v2844_v61 }
 0x17b   : > { %v949_v28 = vsel %vm914_vm7, %v946_v33, %v948_v19  ;;  %v983_v20 = vadd.f32 %v947_v22, %v858_v14  ;;  %v1045_v29 = vmul.f32 %v2381_v58, %v2839_v34  ;;  %v1046_v46 = vmul.f32 %v2381_v58, %v2844_v61 }
 0x17c   : > { %v1604_v18 = vmin.f32 %v1588_v23, 6.0  ;;  %v1605_v45 = vmin.f32 %v1589_v26, 6.0  ;;  %v984_v38 = vadd.f32 %v949_v28, %v859_v40  ;;  %v1047_v31 = vmul.f32 %v2381_v58, %v2846_v3 }
 0x17d   : > { %v1019_v51 = vadd.f32 %v1003_v36, %v983_v20  ;;  %v1105_v41 = vrot.slane %v1045_v29, 1  ;;  %v1106_v42 = vrot.slane %v1046_v46, 1  ;;  %v1169_v50 = vmul.f32 %v2383_v59, %v2839_v34 }
 0x17e   : > { %v1615_v9 = vpack.c.bf16 %v1605_v45, %v1604_v18  ;;  %v1020_v43 = vadd.f32 %v1004_v27, %v984_v38  ;;  %v1108_v44 = vrot.slane %v1047_v31, 1  ;;  %v1170_v5 = vmul.f32 %v2383_v59, %v2844_v61 }
 0x17f   : > { %v1107_v47 = vsel %vm789_vm6, %v1105_v41, %v1106_v42  ;;  %v1171_v49 = vmul.f32 %v2383_v59, %v2846_v3  ;;  %v1229_v56 = vrot.slane %v1169_v50, 2  ;;  %v1287_v54 = vmul.f32 %v2390_v2, %v2907_v37 }
 0x180   : > { %2108 = vmatmul.mubr.msk.bf16.gmra.mrb[8].mxu1 %vm627_vm4, %v1615_v9  ;;  %v1109_v32 = vsel %vm789_vm6, %v1106_v42, %v1108_v44  ;;  %v1143_v10 = vadd.f32 %v1107_v47, %v1019_v51  ;;  %v1230_v55 = vrot.slane %v1170_v5, 2  ;;  %v1288_v39 = vmul.f32 %v2390_v2, %v2911_v17 }
 0x181   : > { %v1144_v52 = vadd.f32 %v1109_v32, %v1020_v43  ;;  %v1232_v4 = vrot.slane %v1171_v49, 2  ;;  %v1329_v57 = vmul.f32 %v2393_v7, %v2907_v37  ;;  %v1330_v60 = vmul.f32 %v2393_v7, %v2911_v17 }
 0x182   : > { %v1231_v0 = vsel %vm914_vm7, %v1229_v56, %v1230_v55  ;;  %v1331_v16 = vmul.f32 %v2393_v7, %v2917_v12  ;;  %v1453_v15 = vmul.f32 %v2504_v30, %v2907_v37  ;;  %v1454_v1 = vmul.f32 %v2504_v30, %v2911_v17 }
 0x183   : > { %v1233_v11 = vsel %vm914_vm7, %v1230_v55, %v1232_v4  ;;  %v1267_v21 = vadd.f32 %v1231_v0, %v1143_v10  ;;  %v1389_v24 = vrot.slane %v1329_v57, 1  ;;  %v1390_v33 = vrot.slane %v1330_v60, 1 }
 0x184   : > { %v1268_v6 = vadd.f32 %v1233_v11, %v1144_v52  ;;  %v1392_v35 = vrot.slane %v1331_v16, 1  ;;  %v1455_v13 = vmul.f32 %v2504_v30, %v2917_v12  ;;  %v1513_v36 = vrot.slane %v1453_v15, 2  ;;  %v697_v15 = vld [vmem:[#allocation2 + $0xe0] sm:$0xff] }
 0x185   : > { %v1303_v25 = vadd.f32 %v1287_v54, %v1267_v21  ;;  %v1391_v14 = vsel %vm789_vm6, %v1389_v24, %v1390_v33  ;;  %v1514_v22 = vrot.slane %v1454_v1, 2  ;;  %v719_v19 = vmul.f32 %v2368_v48, %v2839_v34 }
 0x186   : > { %v1304_v23 = vadd.f32 %v1288_v39, %v1268_v6  ;;  %v1393_v26 = vsel %vm789_vm6, %v1390_v33, %v1392_v35  ;;  %v1516_v40 = vrot.slane %v1455_v13, 2  ;;  %v720_v27 = vmul.f32 %v2368_v48, %v2844_v61  ;;  %v698_v13 = vld [vmem:[#allocation2 + $0xe8] sm:$0x3] }
 0x187   : > { %v1427_v28 = vadd.f32 %v1391_v14, %v1303_v25  ;;  %v1515_v20 = vsel %vm914_vm7, %v1513_v36, %v1514_v22  ;;  %v762_v30 = vmul.f32 %v2386_v62, %v2839_v34  ;;  %v763_v29 = vmul.f32 %v2386_v62, %v2844_v61 }
 0x188   : > { %v1428_v46 = vadd.f32 %v1393_v26, %v1304_v23  ;;  %v1517_v18 = vsel %vm914_vm7, %v1514_v22, %v1516_v40  ;;  %v764_v45 = vmul.f32 %v2386_v62, %v2846_v3  ;;  %v887_v38 = vmul.f32 %v2388_v63, %v2839_v34 }
 0x189   : > { %v1551_v31 = vadd.f32 %v1515_v20, %v1427_v28  ;;  %v825_v48 = vrot.slane %v762_v30, 1  ;;  %v826_v51 = vrot.slane %v763_v29, 1  ;;  %v888_v41 = vmul.f32 %v2388_v63, %v2844_v61  ;;  %v2171_v28 = vld [vmem:[%s3091_s3 + $0x8] ss:$0 sm:$0xff] }
 0x18a   : > { %v1552_v42 = vadd.f32 %v1517_v18, %v1428_v46  ;;  %v828_v50 = vrot.slane %v764_v45, 1  ;;  %v889_v9 = vmul.f32 %v2388_v63, %v2846_v3  ;;  %v950_v43 = vrot.slane %v887_v38, 2 }
 0x18b   : > { %v1574_v44 = vadd.f32 %v2540_v8, %v1551_v31  ;;  %v827_v5 = vsel %vm789_vm6, %v825_v48, %v826_v51  ;;  %v951_v62 = vrot.slane %v888_v41, 2  ;;  %v1005_v34 = vmul.f32 %v2377_v53, %v2907_v37 }
 0x18c   : > { %v1575_v47 = vadd.f32 %v2540_v8, %v1552_v42  ;;  %v829_v49 = vsel %vm789_vm6, %v826_v51, %v828_v50  ;;  %v860_v56 = vadd.f32 %v827_v5, %v719_v19  ;;  %v953_v61 = vrot.slane %v889_v9, 2  ;;  %v696_v8 = vld [vmem:[#allocation2 + $0xd8] sm:$0xff] }
 0x18d   : > { %v1590_v54 = vmax.f32 %v1574_v44, 0.0  ;;  %v861_v32 = vadd.f32 %v829_v49, %v720_v27  ;;  %v952_v10 = vsel %vm914_vm7, %v950_v43, %v951_v62  ;;  %v1006_v63 = vmul.f32 %v2377_v53, %v2911_v17  ;;  %v2172_v49 = vld [vmem:[%s3092_s4] ss:$0 sm:$0xff] }
 0x18e   : > { %v1591_v3 = vmax.f32 %v1575_v47, 0.0  ;;  %v954_v55 = vsel %vm914_vm7, %v951_v62, %v953_v61  ;;  %v985_v39 = vadd.f32 %v952_v10, %v860_v56  ;;  %v1048_v52 = vmul.f32 %v2381_v58, %v2907_v37 }
 0x18f   : > { %v1606_v4 = vmin.f32 %v1590_v54, 6.0  ;;  %v986_v57 = vadd.f32 %v954_v55, %v861_v32  ;;  %v1049_v60 = vmul.f32 %v2381_v58, %v2911_v17  ;;  %v1050_v0 = vmul.f32 %v2381_v58, %v2917_v12  ;;  %v2045_v55 = vld [vmem:[%s2296_s15 + $0x10] sm:$0xff]  }
 0x190   : > { %v1607_v16 = vmin.f32 %v1591_v3, 6.0  ;;  %v1021_v1 = vadd.f32 %v1005_v34, %v985_v39  ;;  %v1110_v53 = vrot.slane %v1048_v52, 1  ;;  %v1172_v11 = vmul.f32 %v2383_v59, %v2907_v37  ;;  %v2044_v39 = vld [vmem:[%s2296_s15 + $0x8] sm:$0xff]   ;;  %v3012_v52 = vld [vmem:[%s3094_s6] ss:$0 sm:$0xff] }
 0x191   : > { %v1022_v21 = vadd.f32 %v1006_v63, %v986_v57  ;;  %v1111_v24 = vrot.slane %v1049_v60, 1  ;;  %v1113_v33 = vrot.slane %v1050_v0, 1  ;;  %v1173_v6 = vmul.f32 %v2383_v59, %v2911_v17 }
 0x192   : > { %v1616_v35 = vpack.c.bf16 %v1607_v16, %v1606_v4  ;;  %v1174_v36 = vmul.f32 %v2383_v59, %v2917_v12  ;;  %v1234_v25 = vrot.slane %v1172_v11, 2  ;;  %v1289_v58 = vmul.f32 %v2390_v2, %v696_v8 }
 0x193   : > { %v1112_v14 = vsel %vm789_vm6, %v1110_v53, %v1111_v24  ;;  %v1114_v22 = vsel %vm789_vm6, %v1111_v24, %v1113_v33  ;;  %v1235_v19 = vrot.slane %v1173_v6, 2  ;;  %v1290_v37 = vmul.f32 %v2390_v2, %v697_v15 }
 0x194   : > { %2111 = vmatprep.mubr.msk.bf16.mxu1 %vm627_vm4, %v1616_v35  ;;  %v1145_v23 = vadd.f32 %v1112_v14, %v1021_v1  ;;  %v1146_v26 = vadd.f32 %v1114_v22, %v1022_v21  ;;  %v1237_v17 = vrot.slane %v1174_v36, 2  ;;  %v1332_v40 = vmul.f32 %v2393_v7, %v696_v8  ;;  %v2047_v36 = vld [vmem:[%s2296_s15 + $0x20] sm:$0xff]  }
 0x195   : > { %v1236_v27 = vsel %vm914_vm7, %v1234_v25, %v1235_v19  ;;  %v1333_v59 = vmul.f32 %v2393_v7, %v697_v15  ;;  %v1334_v12 = vmul.f32 %v2393_v7, %v698_v13  ;;  %v1456_v20 = vmul.f32 %v2171_v28, %v696_v8  ;;  %v2046_v25 = vld [vmem:[%s2296_s15 + $0x18] sm:$0xff]  }
 0x196   : > { %v1238_v2 = vsel %vm914_vm7, %v1235_v19, %v1237_v17  ;;  %v1269_v30 = vadd.f32 %v1236_v27, %v1145_v23  ;;  %v1394_v29 = vrot.slane %v1332_v40, 1  ;;  %v1457_v46 = vmul.f32 %v2171_v28, %v697_v15 }
 0x197   : > { %v1270_v18 = vadd.f32 %v1238_v2, %v1146_v26  ;;  %v1395_v45 = vrot.slane %v1333_v59, 1  ;;  %v1397_v38 = vrot.slane %v1334_v12, 1  ;;  %v1458_v31 = vmul.f32 %v2171_v28, %v698_v13 }
 0x198   : > { %v1305_v48 = vadd.f32 %v1289_v58, %v1269_v30  ;;  %v1519_v51 = vrot.slane %v1457_v46, 2  ;;  %v1518_v7 = vrot.slane %v1456_v20, 2  ;;  %v2018_v4 = vunpack.c.l.bf16 %v2045_v55  ;;  %v2048_v46 = vld [vmem:[%s2296_s15 + $0x28] sm:$0xff]  }
 0x199   : > { %v1306_v41 = vadd.f32 %v1290_v37, %v1270_v18  ;;  %v1396_v42 = vsel %vm789_vm6, %v1394_v29, %v1395_v45  ;;  %v1521_v50 = vrot.slane %v1458_v31, 2  ;;  %v1398_v9 = vsel %vm789_vm6, %v1395_v45, %v1397_v38  ;;  %v2049_v29 = vld [vmem:[%s2296_s15 + $0x30] sm:$0xff]  }
 0x19a   : > { %v1429_v43 = vadd.f32 %v1396_v42, %v1305_v48  ;;  %v1520_v5 = vsel %vm914_vm7, %v1518_v7, %v1519_v51  ;;  %v2014_v57 = vunpack.c.l.bf16 %v2044_v39  ;;  %v2019_v16 = vunpack.c.h.bf16 %v2045_v55 }
 0x19b   : > { %v1430_v44 = vadd.f32 %v1398_v9, %v1306_v41  ;;  %v1522_v62 = vsel %vm914_vm7, %v1519_v51, %v1521_v50  ;;  %v2015_v53 = vunpack.c.h.bf16 %v2044_v39  ;;  %v2026_v58 = vunpack.c.l.bf16 %v2047_v36 }
 0x19c   : > { %v1553_v34 = vadd.f32 %v1520_v5, %v1429_v43  ;;  %v2022_v22 = vunpack.c.l.bf16 %v2046_v25  ;;  %v2027_v23 = vunpack.c.h.bf16 %v2047_v36  ;;  %v2023_v40 = vunpack.c.h.bf16 %v2046_v25 }
 0x19d   : > { %v1554_v47 = vadd.f32 %v1522_v62, %v1430_v44  ;;  %v2034_v18 = vunpack.c.l.bf16 %v2049_v29  ;;  %v2030_v38 = vunpack.c.l.bf16 %v2048_v46  ;;  %v2035_v51 = vunpack.c.h.bf16 %v2049_v29 }
 0x19e   : > { %v1576_v56 = vadd.f32 %v2172_v49, %v1553_v34  ;;  %v2031_v7 = vunpack.c.h.bf16 %v2048_v46 }
 0x19f   : > { %v1577_v61 = vadd.f32 %v2172_v49, %v1554_v47  ;;  %v2051_v47 = vld [vmem:[%s2296_s15 + $0x40] sm:$0xff]   ;;  %v2050_v49 = vld [vmem:[%s2296_s15 + $0x38] sm:$0xff]  }
 0x1a0   : > { %v1592_v54 = vmax.f32 %v1576_v56, 0.0  ;;  %v2042_v56 = vunpack.c.l.bf16 %v2051_v47  ;;  %v2039_v39 = vunpack.c.h.bf16 %v2050_v49 }
 0x1a1   : > { %v1593_v32 = vmax.f32 %v1577_v61, 0.0 }
 0x1a2   : > { %v1608_v10 = vmin.f32 %v1592_v54, 6.0  ;;  %v2038_v54 = vunpack.c.l.bf16 %v2050_v49 }
 0x1a3   : > { %v1609_v63 = vmin.f32 %v1593_v32, 6.0 }
 0x1a5   : > { %v1617_v3 = vpack.c.bf16 %v1609_v63, %v1608_v10  ;;  %v2043_v63 = vunpack.c.h.bf16 %v2051_v47 }
 0x1a7   : > { %2112 = vmatmul.mubr.msk.bf16.gmra.mrb[12].mxu1 %vm627_vm4, %v1617_v3 }
 0x207   : > { %v2101_v8 = vpop.f32.mrb[0].mxu1 }
 0x208   : > { %v1764_v60 = vadd.f32 %v2101_v8, %v3012_v52  ;;  %v1692_v0 = vpop.f32.mrb[1].mxu1 }
 0x209   : > { %v1762_v15 = vadd.f32 %v3012_v52, %v1692_v0  ;;  %v2102_v1 = vpop.f32.mrb[2].mxu1 }
 0x20a   : > { %v1816_v11 = vadd.f32 %v2018_v4, %v1764_v60  ;;  %v1765_v21 = vadd.f32 %v2102_v1, %v3012_v52  ;;  %v1695_v24 = vpop.f32.mrb[3].mxu1 }
 0x20b   : > { %v1814_v33 = vadd.f32 %v2014_v57, %v1762_v15  ;;  %v1763_v6 = vadd.f32 %v3012_v52, %v1695_v24 }
 0x20c   : > { %1832 = vst.msk [vmem:[%s3018_s25 + $0x10] sm:$0xff] %vm380_vm1, %v1816_v11  ;;  %v1817_v35 = vadd.f32 %v2019_v16, %v1765_v21 }
 0x20d   : > { %1830 = vst.msk [vmem:[%s3018_s25] sm:$0xff] %vm380_vm1, %v1814_v33  ;;  %v1815_v13 = vadd.f32 %v2015_v53, %v1763_v6 }
 0x20e   : > { %1833 = vst.msk [vmem:[%s3018_s25 + $0x18] sm:$0xff] %vm380_vm1, %v1817_v35 }
 0x20f   : > { %1831 = vst.msk [vmem:[%s3018_s25 + $0x8] sm:$0xff] %vm380_vm1, %v1815_v13 }
 0x22d   : > { %v2105_v14 = vpop.f32.mrb[4].mxu1 }
 0x22e   : > { %v1768_v19 = vadd.f32 %v2105_v14, %v3012_v52  ;;  %v1708_v37 = vpop.f32.mrb[5].mxu1 }
 0x22f   : > { %v1766_v26 = vadd.f32 %v3012_v52, %v1708_v37  ;;  %v2106_v17 = vpop.f32.mrb[6].mxu1 }
 0x230   : > { %v1820_v27 = vadd.f32 %v2026_v58, %v1768_v19  ;;  %v1769_v59 = vadd.f32 %v2106_v17, %v3012_v52  ;;  %v1711_v12 = vpop.f32.mrb[7].mxu1 }
 0x231   : > { %v1818_v28 = vadd.f32 %v2022_v22, %v1766_v26  ;;  %v1767_v20 = vadd.f32 %v3012_v52, %v1711_v12 }
 0x232   : > { %1836 = vst.msk [vmem:[%s3018_s25 + $0x30] sm:$0xff] %vm380_vm1, %v1820_v27  ;;  %v1821_v2 = vadd.f32 %v2027_v23, %v1769_v59 }
 0x233   : > { %1834 = vst.msk [vmem:[%s3018_s25 + $0x20] sm:$0xff] %vm380_vm1, %v1818_v28  ;;  %v1819_v30 = vadd.f32 %v2023_v40, %v1767_v20 }
 0x234   : > { %1837 = vst.msk [vmem:[%s3018_s25 + $0x38] sm:$0xff] %vm380_vm1, %v1821_v2 }
 0x235   : > { %1835 = vst.msk [vmem:[%s3018_s25 + $0x28] sm:$0xff] %vm380_vm1, %v1819_v30 }
 0x253   : > { %v2109_v45 = vpop.f32.mrb[8].mxu1 }
 0x254   : > { %v1772_v31 = vadd.f32 %v2109_v45, %v3012_v52  ;;  %v1724_v48 = vpop.f32.mrb[9].mxu1 }
 0x255   : > { %v1770_v41 = vadd.f32 %v3012_v52, %v1724_v48  ;;  %v2110_v42 = vpop.f32.mrb[10].mxu1 }
 0x256   : > { %v1824_v50 = vadd.f32 %v2034_v18, %v1772_v31  ;;  %v1773_v9 = vadd.f32 %v2110_v42, %v3012_v52  ;;  %v1727_v43 = vpop.f32.mrb[11].mxu1 }
 0x257   : > { %v1822_v44 = vadd.f32 %v2030_v38, %v1770_v41  ;;  %v1771_v5 = vadd.f32 %v3012_v52, %v1727_v43 }
 0x258   : > { %1840 = vst.msk [vmem:[%s3018_s25 + $0x50] sm:$0xff] %vm380_vm1, %v1824_v50  ;;  %v1825_v62 = vadd.f32 %v2035_v51, %v1773_v9 }
 0x259   : > { %1838 = vst.msk [vmem:[%s3018_s25 + $0x40] sm:$0xff] %vm380_vm1, %v1822_v44  ;;  %v1823_v34 = vadd.f32 %v2031_v7, %v1771_v5 }
 0x25a   : > { %1841 = vst.msk [vmem:[%s3018_s25 + $0x58] sm:$0xff] %vm380_vm1, %v1825_v62 }
 0x25b   : > { %1839 = vst.msk [vmem:[%s3018_s25 + $0x48] sm:$0xff] %vm380_vm1, %v1823_v34 }
 0x27a   : > { %v2113_v61 = vpop.f32.mrb[12].mxu1 }
 0x27b   : > { %v1776_v32 = vadd.f32 %v2113_v61, %v3012_v52  ;;  %v1740_v10 = vpop.f32.mrb[13].mxu1 }
 0x27c   : > { %v1774_v3 = vadd.f32 %v3012_v52, %v1740_v10  ;;  %v2114_v55 = vpop.f32.mrb[14].mxu1 }
 0x27d   : > { %v1828_v4 = vadd.f32 %v2042_v56, %v1776_v32  ;;  %v1777_v8 = vadd.f32 %v2114_v55, %v3012_v52  ;;  %v1743_v57 = vpop.f32.mrb[15].mxu1 }
 0x27e   : > { %v1826_v60 = vadd.f32 %v2038_v54, %v1774_v3  ;;  %v1775_v0 = vadd.f32 %v3012_v52, %v1743_v57 }
 0x27f   : > { %1844 = vst.msk [vmem:[%s3018_s25 + $0x70] sm:$0xff] %vm380_vm1, %v1828_v4  ;;  %v1829_v16 = vadd.f32 %v2043_v63, %v1777_v8 }
 0x280   : > { %1842 = vst.msk [vmem:[%s3018_s25 + $0x60] sm:$0xff] %vm380_vm1, %v1826_v60  ;;  %v1827_v15 = vadd.f32 %v2039_v39, %v1775_v0 }
 0x281   : > { %1845 = vst.msk [vmem:[%s3018_s25 + $0x78] sm:$0xff] %vm380_vm1, %v1829_v16 }
 0x282   : > { %1843 = vst.msk [vmem:[%s3018_s25 + $0x68] sm:$0xff] %vm380_vm1, %v1827_v15 }
 0x283 PF: > { %s17_s28 = sadd.s32 1, %s2211_s28   ;;  %s3100_s24 = smov %s2203_s26 }
 0x284   : > { %p14_p9 = scmp.ge.s32.totalorder %s17_s28, 6   ;;  %s3101_s25 = smov %s2207_s27 }
 0x285   : > { %s3102_s26 = smov %s3105_s29  ;;  %s3103_s27 = smov %s3109_s30 }
 0x286   :  { %16 = sbr.rel (!%p14_p9) target bundleno = 3 (0x3), region = 80 }

</bundles_post_ra>
